<compile_context>
chip_gen: v5e
topology: v5e:2x2
jax: 0.10.0
libtpu: 0.0.40
codegen_flags: <defaults>
</compile_context>

<pallas_src>
import functools

import jax
import jax.numpy as jnp
from jax.experimental import pallas as pl
from jax.experimental.pallas import tpu as pltpu

# ---------------- model hyper-parameters (small, deterministic) -----------------
VOCAB_SIZE = 64
OUTPUT_SIZE = 1        # NOTE: the `sig_out[:, -1]` shortcut (fc(h_T)) is only valid for OUTPUT_SIZE == 1
EMBEDDING_DIM = 32     # equal to HIDDEN_DIM so per-layer W_ih^T can be stacked into one array
HIDDEN_DIM = 32
N_LAYERS = 2
BATCH = 2
SEQ_LEN = 8


# ----------------------------- Pallas kernel ------------------------------------
def _sentiment_rnn_kernel(n_layers, seq_len, batch, hidden_dim, vocab_size,
                          ids_ref, emb_ref, h0_ref, c0_ref,
                          wih_t_ref, whh_t_ref, b_ref,
                          wfc_ref, bfc_ref,
                          sig_ref, hn_ref, cn_ref,
                          xout_scr):
    """Fused embedding gather + stacked-LSTM recurrence + FC head + sigmoid, one VMEM tile.

    ids_ref   : (T*B, 1)  int32   time-major token ids
    emb_ref   : (V, E)    f32     embedding table (resident in VMEM, ~8 KB)
    h0_ref    : (L, B, H) f32
    c0_ref    : (L, B, H) f32
    wih_t_ref : (L, E, 4H) f32    pre-transposed W_ih (E == H)
    whh_t_ref : (L, H, 4H) f32    pre-transposed W_hh
    b_ref     : (L, 1, 4H) f32    pre-fused b_ih + b_hh
    wfc_ref   : (1, H)     f32
    bfc_ref   : (1, 1)     f32
    sig_ref   : (B, 1)     f32  out   sigmoid(fc(h_T of last layer))
    hn_ref    : (L, B, H)  f32  out
    cn_ref    : (L, B, H)  f32  out
    xout_scr  : (T*B, H)   f32  VMEM scratch, time-major per-layer outputs
    """
    H = hidden_dim
    B = batch
    TB = seq_len * batch

    # ---- fused embedding gather: one-hot(ids) @ table (exact, fully vectorized) ----
    ids = ids_ref[...]                                                    # (T*B, 1) int32
    vocab_iota = jax.lax.broadcasted_iota(jnp.int32, (TB, vocab_size), 1)  # (T*B, V)
    onehot = (vocab_iota == ids).astype(jnp.float32)                      # (T*B, V)
    x = jnp.dot(onehot, emb_ref[...].astype(jnp.float32),
                preferred_element_type=jnp.float32)                       # (T*B, E) time-major

    h = h0_ref[0]
    for l in range(n_layers):
        h = h0_ref[l].astype(jnp.float32)                                 # (B, H)
        c = c0_ref[l].astype(jnp.float32)                                 # (B, H)
        whh_t = whh_t_ref[l].astype(jnp.float32)                          # (H, 4H)

        # Hoisted input projection: all timesteps in one MXU pass.
        gates_x = (jnp.dot(x, wih_t_ref[l].astype(jnp.float32),
                           preferred_element_type=jnp.float32)
                   + b_ref[l])                                            # (T*B, 4H)

        for t in range(seq_len):
            gates = gates_x[t * B:(t + 1) * B, :] + jnp.dot(
                h, whh_t, preferred_element_type=jnp.float32)             # (B, 4H)
            # One sigmoid pass + one tanh pass over the full 4H-lane tile, then slice.
            sig_all = jax.nn.sigmoid(gates)
            tanh_all = jnp.tanh(gates)
            i_g = sig_all[:, 0 * H:1 * H]
            f_g = sig_all[:, 1 * H:2 * H]
            g_g = tanh_all[:, 2 * H:3 * H]
            o_g = sig_all[:, 3 * H:4 * H]
            c = f_g * c + i_g * g_g
            h = o_g * jnp.tanh(c)
            xout_scr[t * B:(t + 1) * B, :] = h                            # time-major store

        hn_ref[l] = h
        cn_ref[l] = c
        x = xout_scr[...]                                                 # (T*B, H) next layer input
        # TODO(synk): inter-layer LSTM dropout (drop_prob) and self.dropout(0.3) are
        # training-time stochastic ops; forward here matches eval mode (identity).

    # FC head: OUTPUT_SIZE == 1 -> VPU multiply + lane reduction (avoids a 1-wide MXU pass).
    logits = jnp.sum(h * wfc_ref[...].astype(jnp.float32),
                     axis=-1, keepdims=True) + bfc_ref[...]               # (B, 1)
    sig_ref[...] = jax.nn.sigmoid(logits)


# ------------------------------- wrapper -----------------------------------------
def sentiment_rnn_forward(x_ids, hidden, params):
    """x_ids: (B, T) int32 token ids; hidden: (h0, c0) each (L, B, H)."""
    h0, c0 = hidden
    B, T = x_ids.shape

    # Host-side (free) layout prep: time-major ids, pre-transposed weights, fused bias.
    ids_tm = x_ids.T.reshape(T * B, 1).astype(jnp.int32)                  # (T*B, 1)
    wih_t = jnp.transpose(params["w_ih"], (0, 2, 1))                      # (L, E, 4H)
    whh_t = jnp.transpose(params["w_hh"], (0, 2, 1))                      # (L, H, 4H)
    b_fused = params["b_ih"] + params["b_hh"]                             # (L, 1, 4H)

    kernel = functools.partial(_sentiment_rnn_kernel,
                               N_LAYERS, T, B, HIDDEN_DIM, VOCAB_SIZE)
    vmem = pl.BlockSpec(memory_space=pltpu.MemorySpace.VMEM)

    sig, hn, cn = pl.pallas_call(
        kernel,
        out_shape=(
            jax.ShapeDtypeStruct((B, OUTPUT_SIZE), jnp.float32),
            jax.ShapeDtypeStruct((N_LAYERS, B, HIDDEN_DIM), jnp.float32),
            jax.ShapeDtypeStruct((N_LAYERS, B, HIDDEN_DIM), jnp.float32),
        ),
        in_specs=[vmem] * 9,
        out_specs=(vmem, vmem, vmem),
        scratch_shapes=[pltpu.VMEM((T * B, HIDDEN_DIM), jnp.float32)],
    )(ids_tm, params["embedding"], h0, c0,
      wih_t, whh_t, b_fused,
      params["w_fc"], params["b_fc"])

    # sigmoid(fc(lstm_out)).view(B, -1)[:, -1]  ==  sigmoid(fc(h_T))[:, -1]  (OUTPUT_SIZE == 1)
    sig_out = sig[:, -1]
    return sig_out, (hn, cn)


# --------------------------- pure-JAX reference -----------------------------------
def reference_forward(x_ids, hidden, params):
    h0, c0 = hidden
    x = jnp.take(params["embedding"], x_ids, axis=0)
    H = HIDDEN_DIM
    hs, cs = [], []
    for l in range(N_LAYERS):
        h, c = h0[l], c0[l]
        wih, whh = params["w_ih"][l], params["w_hh"][l]
        b = params["b_ih"][l, 0] + params["b_hh"][l, 0]
        outs = []
        for t in range(x.shape[1]):
            gates = x[:, t, :] @ wih.T + h @ whh.T + b
            i_g = jax.nn.sigmoid(gates[:, 0 * H:1 * H])
            f_g = jax.nn.sigmoid(gates[:, 1 * H:2 * H])
            g_g = jnp.tanh(gates[:, 2 * H:3 * H])
            o_g = jax.nn.sigmoid(gates[:, 3 * H:4 * H])
            c = f_g * c + i_g * g_g
            h = o_g * jnp.tanh(c)
            outs.append(h)
        x = jnp.stack(outs, axis=1)
        hs.append(h)
        cs.append(c)
    sig = jax.nn.sigmoid(x[:, -1, :] @ params["w_fc"].T + params["b_fc"][0])
    return sig[:, -1], (jnp.stack(hs), jnp.stack(cs))


# ------------------------------- parameters ---------------------------------------
def init_params(key):
    ks = jax.random.split(key, 8)
    scale = 1.0 / jnp.sqrt(jnp.float32(HIDDEN_DIM))
    u = lambda k, shape: jax.random.uniform(k, shape, jnp.float32, -scale, scale)
    return {
        "embedding": jax.random.normal(ks[0], (VOCAB_SIZE, EMBEDDING_DIM), jnp.float32) * 0.1,
        "w_ih": u(ks[1], (N_LAYERS, 4 * HIDDEN_DIM, HIDDEN_DIM)),   # layer0 in = E = H
        "w_hh": u(ks[2], (N_LAYERS, 4 * HIDDEN_DIM, HIDDEN_DIM)),
        "b_ih": u(ks[3], (N_LAYERS, 1, 4 * HIDDEN_DIM)),
        "b_hh": u(ks[4], (N_LAYERS, 1, 4 * HIDDEN_DIM)),
        "w_fc": u(ks[5], (OUTPUT_SIZE, HIDDEN_DIM)),
        "b_fc": u(ks[6], (1, OUTPUT_SIZE)),
    }


if __name__ == "__main__":
    key = jax.random.PRNGKey(0)
    k_param, k_x = jax.random.split(key)
    params = init_params(k_param)

    x_ids = jax.random.randint(k_x, (BATCH, SEQ_LEN), 0, VOCAB_SIZE, dtype=jnp.int32)
    # init_hidden(batch_size): zeros of shape (n_layers, batch, hidden_dim)
    h0 = jnp.zeros((N_LAYERS, BATCH, HIDDEN_DIM), jnp.float32)
    c0 = jnp.zeros((N_LAYERS, BATCH, HIDDEN_DIM), jnp.float32)

    sig_out, (hn, cn) = sentiment_rnn_forward(x_ids, (h0, c0), params)
    jax.block_until_ready((sig_out, hn, cn))

    ref_sig, (ref_hn, ref_cn) = reference_forward(x_ids, (h0, c0), params)
    assert sig_out.shape == (BATCH,)
    assert hn.shape == (N_LAYERS, BATCH, HIDDEN_DIM)
    assert jnp.allclose(sig_out, ref_sig, atol=2e-3, rtol=2e-3)
    assert jnp.allclose(hn, ref_hn, atol=2e-3, rtol=2e-3)
    assert jnp.allclose(cn, ref_cn, atol=2e-3, rtol=2e-3)

    print("KERNEL_OK")
</pallas_src>

<mosaic_0001>
module attributes {stable_mosaic.version = 11 : i64} {
  func.func @_sentiment_rnn_kernel(%arg0: memref<16x1xi32, #tpu.memory_space<vmem>>, %arg1: memref<64x32xf32, #tpu.memory_space<vmem>>, %arg2: memref<2x2x32xf32, #tpu.memory_space<vmem>>, %arg3: memref<2x2x32xf32, #tpu.memory_space<vmem>>, %arg4: memref<2x32x128xf32, #tpu.memory_space<vmem>>, %arg5: memref<2x32x128xf32, #tpu.memory_space<vmem>>, %arg6: memref<2x1x128xf32, #tpu.memory_space<vmem>>, %arg7: memref<1x32xf32, #tpu.memory_space<vmem>>, %arg8: memref<1x1xf32, #tpu.memory_space<vmem>>, %arg9: memref<2x1xf32, #tpu.memory_space<vmem>>, %arg10: memref<2x2x32xf32, #tpu.memory_space<vmem>>, %arg11: memref<2x2x32xf32, #tpu.memory_space<vmem>>, %arg12: memref<16x32xf32, #tpu.memory_space<vmem>>) attributes {dimension_semantics = [], scalar_prefetch = 0 : i64, scratch_operands = 1 : i64, tpu.core_type = #tpu.core_type<tc>} {
    %c0 = arith.constant 0 : index
    %c0_0 = arith.constant 0 : index
    %0 = vector.load %arg0[%c0, %c0_0] : memref<16x1xi32, #tpu.memory_space<vmem>>, vector<16x1xi32>
    %1 = tpu.iota {dimensions = array<i32: 1>} : vector<16x64xi32>
    %2 = vector.broadcast %0 : vector<16x1xi32> to vector<16x64xi32>
    %3 = arith.cmpi eq, %1, %2 : vector<16x64xi32>
    %4 = arith.extui %3 : vector<16x64xi1> to vector<16x64xi32>
    %5 = arith.sitofp %4 : vector<16x64xi32> to vector<16x64xf32>
    %c0_1 = arith.constant 0 : index
    %c0_2 = arith.constant 0 : index
    %6 = vector.load %arg1[%c0_1, %c0_2] : memref<64x32xf32, #tpu.memory_space<vmem>>, vector<64x32xf32>
    %cst = arith.constant dense<0.000000e+00> : vector<16x32xf32>
    %7 = tpu.matmul %5, %6, %cst {dimension_numbers = #tpu.dot_dimension_numbers<[1], [0], [0], [1], [0, 0, 1, 1], [], []>} : vector<16x64xf32>, vector<64x32xf32>, vector<16x32xf32> -> vector<16x32xf32>
    %c0_3 = arith.constant 0 : index
    %c0_4 = arith.constant 0 : index
    %c0_5 = arith.constant 0 : index
    %8 = vector.load %arg2[%c0_3, %c0_4, %c0_5] : memref<2x2x32xf32, #tpu.memory_space<vmem>>, vector<1x2x32xf32>
    %9 = vector.shape_cast %8 : vector<1x2x32xf32> to vector<2x32xf32>
    %c0_6 = arith.constant 0 : index
    %c0_7 = arith.constant 0 : index
    %c0_8 = arith.constant 0 : index
    %10 = vector.load %arg3[%c0_6, %c0_7, %c0_8] : memref<2x2x32xf32, #tpu.memory_space<vmem>>, vector<1x2x32xf32>
    %11 = vector.shape_cast %10 : vector<1x2x32xf32> to vector<2x32xf32>
    %c0_9 = arith.constant 0 : index
    %c0_10 = arith.constant 0 : index
    %c0_11 = arith.constant 0 : index
    %12 = vector.load %arg5[%c0_9, %c0_10, %c0_11] : memref<2x32x128xf32, #tpu.memory_space<vmem>>, vector<1x32x128xf32>
    %13 = vector.shape_cast %12 : vector<1x32x128xf32> to vector<32x128xf32>
    %c0_12 = arith.constant 0 : index
    %c0_13 = arith.constant 0 : index
    %c0_14 = arith.constant 0 : index
    %14 = vector.load %arg4[%c0_12, %c0_13, %c0_14] : memref<2x32x128xf32, #tpu.memory_space<vmem>>, vector<1x32x128xf32>
    %15 = vector.shape_cast %14 : vector<1x32x128xf32> to vector<32x128xf32>
    %cst_15 = arith.constant dense<0.000000e+00> : vector<16x128xf32>
    %16 = tpu.matmul %7, %15, %cst_15 {dimension_numbers = #tpu.dot_dimension_numbers<[1], [0], [0], [1], [0, 0, 1, 1], [], []>} : vector<16x32xf32>, vector<32x128xf32>, vector<16x128xf32> -> vector<16x128xf32>
    %c0_16 = arith.constant 0 : index
    %c0_17 = arith.constant 0 : index
    %c0_18 = arith.constant 0 : index
    %17 = vector.load %arg6[%c0_16, %c0_17, %c0_18] : memref<2x1x128xf32, #tpu.memory_space<vmem>>, vector<1x1x128xf32>
    %18 = vector.shape_cast %17 : vector<1x1x128xf32> to vector<1x128xf32>
    %19 = vector.broadcast %18 : vector<1x128xf32> to vector<16x128xf32>
    %20 = arith.addf %16, %19 : vector<16x128xf32>
    %21 = vector.extract_strided_slice %20 {offsets = [0, 0], sizes = [2, 128], strides = [1, 1]} : vector<16x128xf32> to vector<2x128xf32>
    %cst_19 = arith.constant dense<0.000000e+00> : vector<2x128xf32>
    %22 = tpu.matmul %9, %13, %cst_19 {dimension_numbers = #tpu.dot_dimension_numbers<[1], [0], [0], [1], [0, 0, 1, 1], [], []>} : vector<2x32xf32>, vector<32x128xf32>, vector<2x128xf32> -> vector<2x128xf32>
    %23 = arith.addf %21, %22 : vector<2x128xf32>
    %24 = arith.negf %23 : vector<2x128xf32>
    %25 = math.exp %24 : vector<2x128xf32>
    %cst_20 = arith.constant 1.000000e+00 : f32
    %26 = vector.broadcast %cst_20 : f32 to vector<2x128xf32>
    %27 = arith.addf %26, %25 : vector<2x128xf32>
    %28 = arith.divf %26, %27 : vector<2x128xf32>
    %29 = math.tanh %23 : vector<2x128xf32>
    %30 = vector.extract_strided_slice %28 {offsets = [0, 0], sizes = [2, 32], strides = [1, 1]} : vector<2x128xf32> to vector<2x32xf32>
    %31 = vector.extract_strided_slice %28 {offsets = [0, 32], sizes = [2, 32], strides = [1, 1]} : vector<2x128xf32> to vector<2x32xf32>
    %32 = vector.extract_strided_slice %29 {offsets = [0, 64], sizes = [2, 32], strides = [1, 1]} : vector<2x128xf32> to vector<2x32xf32>
    %33 = vector.extract_strided_slice %28 {offsets = [0, 96], sizes = [2, 32], strides = [1, 1]} : vector<2x128xf32> to vector<2x32xf32>
    %34 = arith.mulf %31, %11 : vector<2x32xf32>
    %35 = arith.mulf %30, %32 : vector<2x32xf32>
    %36 = arith.addf %34, %35 : vector<2x32xf32>
    %37 = math.tanh %36 : vector<2x32xf32>
    %38 = arith.mulf %33, %37 : vector<2x32xf32>
    %c0_21 = arith.constant 0 : index
    %c0_22 = arith.constant 0 : index
    %39 = vector.load %arg12[%c0_21, %c0_22] : memref<16x32xf32, #tpu.memory_space<vmem>>, vector<2x32xf32>
    tpu.vector_store %arg12[%c0_21, %c0_22], %38 {strides = array<i32>} : memref<16x32xf32, #tpu.memory_space<vmem>>, vector<2x32xf32>,
    %40 = vector.extract_strided_slice %20 {offsets = [2, 0], sizes = [2, 128], strides = [1, 1]} : vector<16x128xf32> to vector<2x128xf32>
    %cst_23 = arith.constant dense<0.000000e+00> : vector<2x128xf32>
    %41 = tpu.matmul %38, %13, %cst_23 {dimension_numbers = #tpu.dot_dimension_numbers<[1], [0], [0], [1], [0, 0, 1, 1], [], []>} : vector<2x32xf32>, vector<32x128xf32>, vector<2x128xf32> -> vector<2x128xf32>
    %42 = arith.addf %40, %41 : vector<2x128xf32>
    %43 = arith.negf %42 : vector<2x128xf32>
    %44 = math.exp %43 : vector<2x128xf32>
    %cst_24 = arith.constant 1.000000e+00 : f32
    %45 = vector.broadcast %cst_24 : f32 to vector<2x128xf32>
    %46 = arith.addf %45, %44 : vector<2x128xf32>
    %47 = arith.divf %45, %46 : vector<2x128xf32>
    %48 = math.tanh %42 : vector<2x128xf32>
    %49 = vector.extract_strided_slice %47 {offsets = [0, 0], sizes = [2, 32], strides = [1, 1]} : vector<2x128xf32> to vector<2x32xf32>
    %50 = vector.extract_strided_slice %47 {offsets = [0, 32], sizes = [2, 32], strides = [1, 1]} : vector<2x128xf32> to vector<2x32xf32>
    %51 = vector.extract_strided_slice %48 {offsets = [0, 64], sizes = [2, 32], strides = [1, 1]} : vector<2x128xf32> to vector<2x32xf32>
    %52 = vector.extract_strided_slice %47 {offsets = [0, 96], sizes = [2, 32], strides = [1, 1]} : vector<2x128xf32> to vector<2x32xf32>
    %53 = arith.mulf %50, %36 : vector<2x32xf32>
    %54 = arith.mulf %49, %51 : vector<2x32xf32>
    %55 = arith.addf %53, %54 : vector<2x32xf32>
    %56 = math.tanh %55 : vector<2x32xf32>
    %57 = arith.mulf %52, %56 : vector<2x32xf32>
    %c2 = arith.constant 2 : index
    %c0_25 = arith.constant 0 : index
    %58 = vector.load %arg12[%c2, %c0_25] : memref<16x32xf32, #tpu.memory_space<vmem>>, vector<2x32xf32>
    tpu.vector_store %arg12[%c2, %c0_25], %57 {strides = array<i32>} : memref<16x32xf32, #tpu.memory_space<vmem>>, vector<2x32xf32>,
    %59 = vector.extract_strided_slice %20 {offsets = [4, 0], sizes = [2, 128], strides = [1, 1]} : vector<16x128xf32> to vector<2x128xf32>
    %cst_26 = arith.constant dense<0.000000e+00> : vector<2x128xf32>
    %60 = tpu.matmul %57, %13, %cst_26 {dimension_numbers = #tpu.dot_dimension_numbers<[1], [0], [0], [1], [0, 0, 1, 1], [], []>} : vector<2x32xf32>, vector<32x128xf32>, vector<2x128xf32> -> vector<2x128xf32>
    %61 = arith.addf %59, %60 : vector<2x128xf32>
    %62 = arith.negf %61 : vector<2x128xf32>
    %63 = math.exp %62 : vector<2x128xf32>
    %cst_27 = arith.constant 1.000000e+00 : f32
    %64 = vector.broadcast %cst_27 : f32 to vector<2x128xf32>
    %65 = arith.addf %64, %63 : vector<2x128xf32>
    %66 = arith.divf %64, %65 : vector<2x128xf32>
    %67 = math.tanh %61 : vector<2x128xf32>
    %68 = vector.extract_strided_slice %66 {offsets = [0, 0], sizes = [2, 32], strides = [1, 1]} : vector<2x128xf32> to vector<2x32xf32>
    %69 = vector.extract_strided_slice %66 {offsets = [0, 32], sizes = [2, 32], strides = [1, 1]} : vector<2x128xf32> to vector<2x32xf32>
    %70 = vector.extract_strided_slice %67 {offsets = [0, 64], sizes = [2, 32], strides = [1, 1]} : vector<2x128xf32> to vector<2x32xf32>
    %71 = vector.extract_strided_slice %66 {offsets = [0, 96], sizes = [2, 32], strides = [1, 1]} : vector<2x128xf32> to vector<2x32xf32>
    %72 = arith.mulf %69, %55 : vector<2x32xf32>
    %73 = arith.mulf %68, %70 : vector<2x32xf32>
    %74 = arith.addf %72, %73 : vector<2x32xf32>
    %75 = math.tanh %74 : vector<2x32xf32>
    %76 = arith.mulf %71, %75 : vector<2x32xf32>
    %c4 = arith.constant 4 : index
    %c0_28 = arith.constant 0 : index
    %77 = vector.load %arg12[%c4, %c0_28] : memref<16x32xf32, #tpu.memory_space<vmem>>, vector<2x32xf32>
    tpu.vector_store %arg12[%c4, %c0_28], %76 {strides = array<i32>} : memref<16x32xf32, #tpu.memory_space<vmem>>, vector<2x32xf32>,
    %78 = vector.extract_strided_slice %20 {offsets = [6, 0], sizes = [2, 128], strides = [1, 1]} : vector<16x128xf32> to vector<2x128xf32>
    %cst_29 = arith.constant dense<0.000000e+00> : vector<2x128xf32>
    %79 = tpu.matmul %76, %13, %cst_29 {dimension_numbers = #tpu.dot_dimension_numbers<[1], [0], [0], [1], [0, 0, 1, 1], [], []>} : vector<2x32xf32>, vector<32x128xf32>, vector<2x128xf32> -> vector<2x128xf32>
    %80 = arith.addf %78, %79 : vector<2x128xf32>
    %81 = arith.negf %80 : vector<2x128xf32>
    %82 = math.exp %81 : vector<2x128xf32>
    %cst_30 = arith.constant 1.000000e+00 : f32
    %83 = vector.broadcast %cst_30 : f32 to vector<2x128xf32>
    %84 = arith.addf %83, %82 : vector<2x128xf32>
    %85 = arith.divf %83, %84 : vector<2x128xf32>
    %86 = math.tanh %80 : vector<2x128xf32>
    %87 = vector.extract_strided_slice %85 {offsets = [0, 0], sizes = [2, 32], strides = [1, 1]} : vector<2x128xf32> to vector<2x32xf32>
    %88 = vector.extract_strided_slice %85 {offsets = [0, 32], sizes = [2, 32], strides = [1, 1]} : vector<2x128xf32> to vector<2x32xf32>
    %89 = vector.extract_strided_slice %86 {offsets = [0, 64], sizes = [2, 32], strides = [1, 1]} : vector<2x128xf32> to vector<2x32xf32>
    %90 = vector.extract_strided_slice %85 {offsets = [0, 96], sizes = [2, 32], strides = [1, 1]} : vector<2x128xf32> to vector<2x32xf32>
    %91 = arith.mulf %88, %74 : vector<2x32xf32>
    %92 = arith.mulf %87, %89 : vector<2x32xf32>
    %93 = arith.addf %91, %92 : vector<2x32xf32>
    %94 = math.tanh %93 : vector<2x32xf32>
    %95 = arith.mulf %90, %94 : vector<2x32xf32>
    %c6 = arith.constant 6 : index
    %c0_31 = arith.constant 0 : index
    %96 = vector.load %arg12[%c6, %c0_31] : memref<16x32xf32, #tpu.memory_space<vmem>>, vector<2x32xf32>
    tpu.vector_store %arg12[%c6, %c0_31], %95 {strides = array<i32>} : memref<16x32xf32, #tpu.memory_space<vmem>>, vector<2x32xf32>,
    %97 = vector.extract_strided_slice %20 {offsets = [8, 0], sizes = [2, 128], strides = [1, 1]} : vector<16x128xf32> to vector<2x128xf32>
    %cst_32 = arith.constant dense<0.000000e+00> : vector<2x128xf32>
    %98 = tpu.matmul %95, %13, %cst_32 {dimension_numbers = #tpu.dot_dimension_numbers<[1], [0], [0], [1], [0, 0, 1, 1], [], []>} : vector<2x32xf32>, vector<32x128xf32>, vector<2x128xf32> -> vector<2x128xf32>
    %99 = arith.addf %97, %98 : vector<2x128xf32>
    %100 = arith.negf %99 : vector<2x128xf32>
    %101 = math.exp %100 : vector<2x128xf32>
    %cst_33 = arith.constant 1.000000e+00 : f32
    %102 = vector.broadcast %cst_33 : f32 to vector<2x128xf32>
    %103 = arith.addf %102, %101 : vector<2x128xf32>
    %104 = arith.divf %102, %103 : vector<2x128xf32>
    %105 = math.tanh %99 : vector<2x128xf32>
    %106 = vector.extract_strided_slice %104 {offsets = [0, 0], sizes = [2, 32], strides = [1, 1]} : vector<2x128xf32> to vector<2x32xf32>
    %107 = vector.extract_strided_slice %104 {offsets = [0, 32], sizes = [2, 32], strides = [1, 1]} : vector<2x128xf32> to vector<2x32xf32>
    %108 = vector.extract_strided_slice %105 {offsets = [0, 64], sizes = [2, 32], strides = [1, 1]} : vector<2x128xf32> to vector<2x32xf32>
    %109 = vector.extract_strided_slice %104 {offsets = [0, 96], sizes = [2, 32], strides = [1, 1]} : vector<2x128xf32> to vector<2x32xf32>
    %110 = arith.mulf %107, %93 : vector<2x32xf32>
    %111 = arith.mulf %106, %108 : vector<2x32xf32>
    %112 = arith.addf %110, %111 : vector<2x32xf32>
    %113 = math.tanh %112 : vector<2x32xf32>
    %114 = arith.mulf %109, %113 : vector<2x32xf32>
    %c8 = arith.constant 8 : index
    %c0_34 = arith.constant 0 : index
    %115 = vector.load %arg12[%c8, %c0_34] : memref<16x32xf32, #tpu.memory_space<vmem>>, vector<2x32xf32>
    tpu.vector_store %arg12[%c8, %c0_34], %114 {strides = array<i32>} : memref<16x32xf32, #tpu.memory_space<vmem>>, vector<2x32xf32>,
    %116 = vector.extract_strided_slice %20 {offsets = [10, 0], sizes = [2, 128], strides = [1, 1]} : vector<16x128xf32> to vector<2x128xf32>
    %cst_35 = arith.constant dense<0.000000e+00> : vector<2x128xf32>
    %117 = tpu.matmul %114, %13, %cst_35 {dimension_numbers = #tpu.dot_dimension_numbers<[1], [0], [0], [1], [0, 0, 1, 1], [], []>} : vector<2x32xf32>, vector<32x128xf32>, vector<2x128xf32> -> vector<2x128xf32>
    %118 = arith.addf %116, %117 : vector<2x128xf32>
    %119 = arith.negf %118 : vector<2x128xf32>
    %120 = math.exp %119 : vector<2x128xf32>
    %cst_36 = arith.constant 1.000000e+00 : f32
    %121 = vector.broadcast %cst_36 : f32 to vector<2x128xf32>
    %122 = arith.addf %121, %120 : vector<2x128xf32>
    %123 = arith.divf %121, %122 : vector<2x128xf32>
    %124 = math.tanh %118 : vector<2x128xf32>
    %125 = vector.extract_strided_slice %123 {offsets = [0, 0], sizes = [2, 32], strides = [1, 1]} : vector<2x128xf32> to vector<2x32xf32>
    %126 = vector.extract_strided_slice %123 {offsets = [0, 32], sizes = [2, 32], strides = [1, 1]} : vector<2x128xf32> to vector<2x32xf32>
    %127 = vector.extract_strided_slice %124 {offsets = [0, 64], sizes = [2, 32], strides = [1, 1]} : vector<2x128xf32> to vector<2x32xf32>
    %128 = vector.extract_strided_slice %123 {offsets = [0, 96], sizes = [2, 32], strides = [1, 1]} : vector<2x128xf32> to vector<2x32xf32>
    %129 = arith.mulf %126, %112 : vector<2x32xf32>
    %130 = arith.mulf %125, %127 : vector<2x32xf32>
    %131 = arith.addf %129, %130 : vector<2x32xf32>
    %132 = math.tanh %131 : vector<2x32xf32>
    %133 = arith.mulf %128, %132 : vector<2x32xf32>
    %c10 = arith.constant 10 : index
    %c0_37 = arith.constant 0 : index
    %134 = vector.load %arg12[%c10, %c0_37] : memref<16x32xf32, #tpu.memory_space<vmem>>, vector<2x32xf32>
    tpu.vector_store %arg12[%c10, %c0_37], %133 {strides = array<i32>} : memref<16x32xf32, #tpu.memory_space<vmem>>, vector<2x32xf32>,
    %135 = vector.extract_strided_slice %20 {offsets = [12, 0], sizes = [2, 128], strides = [1, 1]} : vector<16x128xf32> to vector<2x128xf32>
    %cst_38 = arith.constant dense<0.000000e+00> : vector<2x128xf32>
    %136 = tpu.matmul %133, %13, %cst_38 {dimension_numbers = #tpu.dot_dimension_numbers<[1], [0], [0], [1], [0, 0, 1, 1], [], []>} : vector<2x32xf32>, vector<32x128xf32>, vector<2x128xf32> -> vector<2x128xf32>
    %137 = arith.addf %135, %136 : vector<2x128xf32>
    %138 = arith.negf %137 : vector<2x128xf32>
    %139 = math.exp %138 : vector<2x128xf32>
    %cst_39 = arith.constant 1.000000e+00 : f32
    %140 = vector.broadcast %cst_39 : f32 to vector<2x128xf32>
    %141 = arith.addf %140, %139 : vector<2x128xf32>
    %142 = arith.divf %140, %141 : vector<2x128xf32>
    %143 = math.tanh %137 : vector<2x128xf32>
    %144 = vector.extract_strided_slice %142 {offsets = [0, 0], sizes = [2, 32], strides = [1, 1]} : vector<2x128xf32> to vector<2x32xf32>
    %145 = vector.extract_strided_slice %142 {offsets = [0, 32], sizes = [2, 32], strides = [1, 1]} : vector<2x128xf32> to vector<2x32xf32>
    %146 = vector.extract_strided_slice %143 {offsets = [0, 64], sizes = [2, 32], strides = [1, 1]} : vector<2x128xf32> to vector<2x32xf32>
    %147 = vector.extract_strided_slice %142 {offsets = [0, 96], sizes = [2, 32], strides = [1, 1]} : vector<2x128xf32> to vector<2x32xf32>
    %148 = arith.mulf %145, %131 : vector<2x32xf32>
    %149 = arith.mulf %144, %146 : vector<2x32xf32>
    %150 = arith.addf %148, %149 : vector<2x32xf32>
    %151 = math.tanh %150 : vector<2x32xf32>
    %152 = arith.mulf %147, %151 : vector<2x32xf32>
    %c12 = arith.constant 12 : index
    %c0_40 = arith.constant 0 : index
    %153 = vector.load %arg12[%c12, %c0_40] : memref<16x32xf32, #tpu.memory_space<vmem>>, vector<2x32xf32>
    tpu.vector_store %arg12[%c12, %c0_40], %152 {strides = array<i32>} : memref<16x32xf32, #tpu.memory_space<vmem>>, vector<2x32xf32>,
    %154 = vector.extract_strided_slice %20 {offsets = [14, 0], sizes = [2, 128], strides = [1, 1]} : vector<16x128xf32> to vector<2x128xf32>
    %cst_41 = arith.constant dense<0.000000e+00> : vector<2x128xf32>
    %155 = tpu.matmul %152, %13, %cst_41 {dimension_numbers = #tpu.dot_dimension_numbers<[1], [0], [0], [1], [0, 0, 1, 1], [], []>} : vector<2x32xf32>, vector<32x128xf32>, vector<2x128xf32> -> vector<2x128xf32>
    %156 = arith.addf %154, %155 : vector<2x128xf32>
    %157 = arith.negf %156 : vector<2x128xf32>
    %158 = math.exp %157 : vector<2x128xf32>
    %cst_42 = arith.constant 1.000000e+00 : f32
    %159 = vector.broadcast %cst_42 : f32 to vector<2x128xf32>
    %160 = arith.addf %159, %158 : vector<2x128xf32>
    %161 = arith.divf %159, %160 : vector<2x128xf32>
    %162 = math.tanh %156 : vector<2x128xf32>
    %163 = vector.extract_strided_slice %161 {offsets = [0, 0], sizes = [2, 32], strides = [1, 1]} : vector<2x128xf32> to vector<2x32xf32>
    %164 = vector.extract_strided_slice %161 {offsets = [0, 32], sizes = [2, 32], strides = [1, 1]} : vector<2x128xf32> to vector<2x32xf32>
    %165 = vector.extract_strided_slice %162 {offsets = [0, 64], sizes = [2, 32], strides = [1, 1]} : vector<2x128xf32> to vector<2x32xf32>
    %166 = vector.extract_strided_slice %161 {offsets = [0, 96], sizes = [2, 32], strides = [1, 1]} : vector<2x128xf32> to vector<2x32xf32>
    %167 = arith.mulf %164, %150 : vector<2x32xf32>
    %168 = arith.mulf %163, %165 : vector<2x32xf32>
    %169 = arith.addf %167, %168 : vector<2x32xf32>
    %170 = math.tanh %169 : vector<2x32xf32>
    %171 = arith.mulf %166, %170 : vector<2x32xf32>
    %c14 = arith.constant 14 : index
    %c0_43 = arith.constant 0 : index
    %172 = vector.load %arg12[%c14, %c0_43] : memref<16x32xf32, #tpu.memory_space<vmem>>, vector<2x32xf32>
    tpu.vector_store %arg12[%c14, %c0_43], %171 {strides = array<i32>} : memref<16x32xf32, #tpu.memory_space<vmem>>, vector<2x32xf32>,
    %c0_44 = arith.constant 0 : index
    %c0_45 = arith.constant 0 : index
    %c0_46 = arith.constant 0 : index
    %173 = vector.load %arg10[%c0_44, %c0_45, %c0_46] : memref<2x2x32xf32, #tpu.memory_space<vmem>>, vector<1x2x32xf32>
    %174 = vector.shape_cast %173 : vector<1x2x32xf32> to vector<2x32xf32>
    %175 = vector.shape_cast %171 : vector<2x32xf32> to vector<1x2x32xf32>
    tpu.vector_store %arg10[%c0_44, %c0_45, %c0_46], %175 {strides = array<i32>} : memref<2x2x32xf32, #tpu.memory_space<vmem>>, vector<1x2x32xf32>,
    %c0_47 = arith.constant 0 : index
    %c0_48 = arith.constant 0 : index
    %c0_49 = arith.constant 0 : index
    %176 = vector.load %arg11[%c0_47, %c0_48, %c0_49] : memref<2x2x32xf32, #tpu.memory_space<vmem>>, vector<1x2x32xf32>
    %177 = vector.shape_cast %176 : vector<1x2x32xf32> to vector<2x32xf32>
    %178 = vector.shape_cast %169 : vector<2x32xf32> to vector<1x2x32xf32>
    tpu.vector_store %arg11[%c0_47, %c0_48, %c0_49], %178 {strides = array<i32>} : memref<2x2x32xf32, #tpu.memory_space<vmem>>, vector<1x2x32xf32>,
    %c0_50 = arith.constant 0 : index
    %c0_51 = arith.constant 0 : index
    %179 = vector.load %arg12[%c0_50, %c0_51] : memref<16x32xf32, #tpu.memory_space<vmem>>, vector<16x32xf32>
    %c1 = arith.constant 1 : index
    %c0_52 = arith.constant 0 : index
    %c0_53 = arith.constant 0 : index
    %180 = vector.load %arg2[%c1, %c0_52, %c0_53] : memref<2x2x32xf32, #tpu.memory_space<vmem>>, vector<1x2x32xf32>
    %181 = vector.shape_cast %180 : vector<1x2x32xf32> to vector<2x32xf32>
    %c1_54 = arith.constant 1 : index
    %c0_55 = arith.constant 0 : index
    %c0_56 = arith.constant 0 : index
    %182 = vector.load %arg3[%c1_54, %c0_55, %c0_56] : memref<2x2x32xf32, #tpu.memory_space<vmem>>, vector<1x2x32xf32>
    %183 = vector.shape_cast %182 : vector<1x2x32xf32> to vector<2x32xf32>
    %c1_57 = arith.constant 1 : index
    %c0_58 = arith.constant 0 : index
    %c0_59 = arith.constant 0 : index
    %184 = vector.load %arg5[%c1_57, %c0_58, %c0_59] : memref<2x32x128xf32, #tpu.memory_space<vmem>>, vector<1x32x128xf32>
    %185 = vector.shape_cast %184 : vector<1x32x128xf32> to vector<32x128xf32>
    %c1_60 = arith.constant 1 : index
    %c0_61 = arith.constant 0 : index
    %c0_62 = arith.constant 0 : index
    %186 = vector.load %arg4[%c1_60, %c0_61, %c0_62] : memref<2x32x128xf32, #tpu.memory_space<vmem>>, vector<1x32x128xf32>
    %187 = vector.shape_cast %186 : vector<1x32x128xf32> to vector<32x128xf32>
    %cst_63 = arith.constant dense<0.000000e+00> : vector<16x128xf32>
    %188 = tpu.matmul %179, %187, %cst_63 {dimension_numbers = #tpu.dot_dimension_numbers<[1], [0], [0], [1], [0, 0, 1, 1], [], []>} : vector<16x32xf32>, vector<32x128xf32>, vector<16x128xf32> -> vector<16x128xf32>
    %c1_64 = arith.constant 1 : index
    %c0_65 = arith.constant 0 : index
    %c0_66 = arith.constant 0 : index
    %189 = vector.load %arg6[%c1_64, %c0_65, %c0_66] : memref<2x1x128xf32, #tpu.memory_space<vmem>>, vector<1x1x128xf32>
    %190 = vector.shape_cast %189 : vector<1x1x128xf32> to vector<1x128xf32>
    %191 = vector.broadcast %190 : vector<1x128xf32> to vector<16x128xf32>
    %192 = arith.addf %188, %191 : vector<16x128xf32>
    %193 = vector.extract_strided_slice %192 {offsets = [0, 0], sizes = [2, 128], strides = [1, 1]} : vector<16x128xf32> to vector<2x128xf32>
    %cst_67 = arith.constant dense<0.000000e+00> : vector<2x128xf32>
    %194 = tpu.matmul %181, %185, %cst_67 {dimension_numbers = #tpu.dot_dimension_numbers<[1], [0], [0], [1], [0, 0, 1, 1], [], []>} : vector<2x32xf32>, vector<32x128xf32>, vector<2x128xf32> -> vector<2x128xf32>
    %195 = arith.addf %193, %194 : vector<2x128xf32>
    %196 = arith.negf %195 : vector<2x128xf32>
    %197 = math.exp %196 : vector<2x128xf32>
    %cst_68 = arith.constant 1.000000e+00 : f32
    %198 = vector.broadcast %cst_68 : f32 to vector<2x128xf32>
    %199 = arith.addf %198, %197 : vector<2x128xf32>
    %200 = arith.divf %198, %199 : vector<2x128xf32>
    %201 = math.tanh %195 : vector<2x128xf32>
    %202 = vector.extract_strided_slice %200 {offsets = [0, 0], sizes = [2, 32], strides = [1, 1]} : vector<2x128xf32> to vector<2x32xf32>
    %203 = vector.extract_strided_slice %200 {offsets = [0, 32], sizes = [2, 32], strides = [1, 1]} : vector<2x128xf32> to vector<2x32xf32>
    %204 = vector.extract_strided_slice %201 {offsets = [0, 64], sizes = [2, 32], strides = [1, 1]} : vector<2x128xf32> to vector<2x32xf32>
    %205 = vector.extract_strided_slice %200 {offsets = [0, 96], sizes = [2, 32], strides = [1, 1]} : vector<2x128xf32> to vector<2x32xf32>
    %206 = arith.mulf %203, %183 : vector<2x32xf32>
    %207 = arith.mulf %202, %204 : vector<2x32xf32>
    %208 = arith.addf %206, %207 : vector<2x32xf32>
    %209 = math.tanh %208 : vector<2x32xf32>
    %210 = arith.mulf %205, %209 : vector<2x32xf32>
    %c0_69 = arith.constant 0 : index
    %c0_70 = arith.constant 0 : index
    %211 = vector.load %arg12[%c0_69, %c0_70] : memref<16x32xf32, #tpu.memory_space<vmem>>, vector<2x32xf32>
    tpu.vector_store %arg12[%c0_69, %c0_70], %210 {strides = array<i32>} : memref<16x32xf32, #tpu.memory_space<vmem>>, vector<2x32xf32>,
    %212 = vector.extract_strided_slice %192 {offsets = [2, 0], sizes = [2, 128], strides = [1, 1]} : vector<16x128xf32> to vector<2x128xf32>
    %cst_71 = arith.constant dense<0.000000e+00> : vector<2x128xf32>
    %213 = tpu.matmul %210, %185, %cst_71 {dimension_numbers = #tpu.dot_dimension_numbers<[1], [0], [0], [1], [0, 0, 1, 1], [], []>} : vector<2x32xf32>, vector<32x128xf32>, vector<2x128xf32> -> vector<2x128xf32>
    %214 = arith.addf %212, %213 : vector<2x128xf32>
    %215 = arith.negf %214 : vector<2x128xf32>
    %216 = math.exp %215 : vector<2x128xf32>
    %cst_72 = arith.constant 1.000000e+00 : f32
    %217 = vector.broadcast %cst_72 : f32 to vector<2x128xf32>
    %218 = arith.addf %217, %216 : vector<2x128xf32>
    %219 = arith.divf %217, %218 : vector<2x128xf32>
    %220 = math.tanh %214 : vector<2x128xf32>
    %221 = vector.extract_strided_slice %219 {offsets = [0, 0], sizes = [2, 32], strides = [1, 1]} : vector<2x128xf32> to vector<2x32xf32>
    %222 = vector.extract_strided_slice %219 {offsets = [0, 32], sizes = [2, 32], strides = [1, 1]} : vector<2x128xf32> to vector<2x32xf32>
    %223 = vector.extract_strided_slice %220 {offsets = [0, 64], sizes = [2, 32], strides = [1, 1]} : vector<2x128xf32> to vector<2x32xf32>
    %224 = vector.extract_strided_slice %219 {offsets = [0, 96], sizes = [2, 32], strides = [1, 1]} : vector<2x128xf32> to vector<2x32xf32>
    %225 = arith.mulf %222, %208 : vector<2x32xf32>
    %226 = arith.mulf %221, %223 : vector<2x32xf32>
    %227 = arith.addf %225, %226 : vector<2x32xf32>
    %228 = math.tanh %227 : vector<2x32xf32>
    %229 = arith.mulf %224, %228 : vector<2x32xf32>
    %c2_73 = arith.constant 2 : index
    %c0_74 = arith.constant 0 : index
    %230 = vector.load %arg12[%c2_73, %c0_74] : memref<16x32xf32, #tpu.memory_space<vmem>>, vector<2x32xf32>
    tpu.vector_store %arg12[%c2_73, %c0_74], %229 {strides = array<i32>} : memref<16x32xf32, #tpu.memory_space<vmem>>, vector<2x32xf32>,
    %231 = vector.extract_strided_slice %192 {offsets = [4, 0], sizes = [2, 128], strides = [1, 1]} : vector<16x128xf32> to vector<2x128xf32>
    %cst_75 = arith.constant dense<0.000000e+00> : vector<2x128xf32>
    %232 = tpu.matmul %229, %185, %cst_75 {dimension_numbers = #tpu.dot_dimension_numbers<[1], [0], [0], [1], [0, 0, 1, 1], [], []>} : vector<2x32xf32>, vector<32x128xf32>, vector<2x128xf32> -> vector<2x128xf32>
    %233 = arith.addf %231, %232 : vector<2x128xf32>
    %234 = arith.negf %233 : vector<2x128xf32>
    %235 = math.exp %234 : vector<2x128xf32>
    %cst_76 = arith.constant 1.000000e+00 : f32
    %236 = vector.broadcast %cst_76 : f32 to vector<2x128xf32>
    %237 = arith.addf %236, %235 : vector<2x128xf32>
    %238 = arith.divf %236, %237 : vector<2x128xf32>
    %239 = math.tanh %233 : vector<2x128xf32>
    %240 = vector.extract_strided_slice %238 {offsets = [0, 0], sizes = [2, 32], strides = [1, 1]} : vector<2x128xf32> to vector<2x32xf32>
    %241 = vector.extract_strided_slice %238 {offsets = [0, 32], sizes = [2, 32], strides = [1, 1]} : vector<2x128xf32> to vector<2x32xf32>
    %242 = vector.extract_strided_slice %239 {offsets = [0, 64], sizes = [2, 32], strides = [1, 1]} : vector<2x128xf32> to vector<2x32xf32>
    %243 = vector.extract_strided_slice %238 {offsets = [0, 96], sizes = [2, 32], strides = [1, 1]} : vector<2x128xf32> to vector<2x32xf32>
    %244 = arith.mulf %241, %227 : vector<2x32xf32>
    %245 = arith.mulf %240, %242 : vector<2x32xf32>
    %246 = arith.addf %244, %245 : vector<2x32xf32>
    %247 = math.tanh %246 : vector<2x32xf32>
    %248 = arith.mulf %243, %247 : vector<2x32xf32>
    %c4_77 = arith.constant 4 : index
    %c0_78 = arith.constant 0 : index
    %249 = vector.load %arg12[%c4_77, %c0_78] : memref<16x32xf32, #tpu.memory_space<vmem>>, vector<2x32xf32>
    tpu.vector_store %arg12[%c4_77, %c0_78], %248 {strides = array<i32>} : memref<16x32xf32, #tpu.memory_space<vmem>>, vector<2x32xf32>,
    %250 = vector.extract_strided_slice %192 {offsets = [6, 0], sizes = [2, 128], strides = [1, 1]} : vector<16x128xf32> to vector<2x128xf32>
    %cst_79 = arith.constant dense<0.000000e+00> : vector<2x128xf32>
    %251 = tpu.matmul %248, %185, %cst_79 {dimension_numbers = #tpu.dot_dimension_numbers<[1], [0], [0], [1], [0, 0, 1, 1], [], []>} : vector<2x32xf32>, vector<32x128xf32>, vector<2x128xf32> -> vector<2x128xf32>
    %252 = arith.addf %250, %251 : vector<2x128xf32>
    %253 = arith.negf %252 : vector<2x128xf32>
    %254 = math.exp %253 : vector<2x128xf32>
    %cst_80 = arith.constant 1.000000e+00 : f32
    %255 = vector.broadcast %cst_80 : f32 to vector<2x128xf32>
    %256 = arith.addf %255, %254 : vector<2x128xf32>
    %257 = arith.divf %255, %256 : vector<2x128xf32>
    %258 = math.tanh %252 : vector<2x128xf32>
    %259 = vector.extract_strided_slice %257 {offsets = [0, 0], sizes = [2, 32], strides = [1, 1]} : vector<2x128xf32> to vector<2x32xf32>
    %260 = vector.extract_strided_slice %257 {offsets = [0, 32], sizes = [2, 32], strides = [1, 1]} : vector<2x128xf32> to vector<2x32xf32>
    %261 = vector.extract_strided_slice %258 {offsets = [0, 64], sizes = [2, 32], strides = [1, 1]} : vector<2x128xf32> to vector<2x32xf32>
    %262 = vector.extract_strided_slice %257 {offsets = [0, 96], sizes = [2, 32], strides = [1, 1]} : vector<2x128xf32> to vector<2x32xf32>
    %263 = arith.mulf %260, %246 : vector<2x32xf32>
    %264 = arith.mulf %259, %261 : vector<2x32xf32>
    %265 = arith.addf %263, %264 : vector<2x32xf32>
    %266 = math.tanh %265 : vector<2x32xf32>
    %267 = arith.mulf %262, %266 : vector<2x32xf32>
    %c6_81 = arith.constant 6 : index
    %c0_82 = arith.constant 0 : index
    %268 = vector.load %arg12[%c6_81, %c0_82] : memref<16x32xf32, #tpu.memory_space<vmem>>, vector<2x32xf32>
    tpu.vector_store %arg12[%c6_81, %c0_82], %267 {strides = array<i32>} : memref<16x32xf32, #tpu.memory_space<vmem>>, vector<2x32xf32>,
    %269 = vector.extract_strided_slice %192 {offsets = [8, 0], sizes = [2, 128], strides = [1, 1]} : vector<16x128xf32> to vector<2x128xf32>
    %cst_83 = arith.constant dense<0.000000e+00> : vector<2x128xf32>
    %270 = tpu.matmul %267, %185, %cst_83 {dimension_numbers = #tpu.dot_dimension_numbers<[1], [0], [0], [1], [0, 0, 1, 1], [], []>} : vector<2x32xf32>, vector<32x128xf32>, vector<2x128xf32> -> vector<2x128xf32>
    %271 = arith.addf %269, %270 : vector<2x128xf32>
    %272 = arith.negf %271 : vector<2x128xf32>
    %273 = math.exp %272 : vector<2x128xf32>
    %cst_84 = arith.constant 1.000000e+00 : f32
    %274 = vector.broadcast %cst_84 : f32 to vector<2x128xf32>
    %275 = arith.addf %274, %273 : vector<2x128xf32>
    %276 = arith.divf %274, %275 : vector<2x128xf32>
    %277 = math.tanh %271 : vector<2x128xf32>
    %278 = vector.extract_strided_slice %276 {offsets = [0, 0], sizes = [2, 32], strides = [1, 1]} : vector<2x128xf32> to vector<2x32xf32>
    %279 = vector.extract_strided_slice %276 {offsets = [0, 32], sizes = [2, 32], strides = [1, 1]} : vector<2x128xf32> to vector<2x32xf32>
    %280 = vector.extract_strided_slice %277 {offsets = [0, 64], sizes = [2, 32], strides = [1, 1]} : vector<2x128xf32> to vector<2x32xf32>
    %281 = vector.extract_strided_slice %276 {offsets = [0, 96], sizes = [2, 32], strides = [1, 1]} : vector<2x128xf32> to vector<2x32xf32>
    %282 = arith.mulf %279, %265 : vector<2x32xf32>
    %283 = arith.mulf %278, %280 : vector<2x32xf32>
    %284 = arith.addf %282, %283 : vector<2x32xf32>
    %285 = math.tanh %284 : vector<2x32xf32>
    %286 = arith.mulf %281, %285 : vector<2x32xf32>
    %c8_85 = arith.constant 8 : index
    %c0_86 = arith.constant 0 : index
    %287 = vector.load %arg12[%c8_85, %c0_86] : memref<16x32xf32, #tpu.memory_space<vmem>>, vector<2x32xf32>
    tpu.vector_store %arg12[%c8_85, %c0_86], %286 {strides = array<i32>} : memref<16x32xf32, #tpu.memory_space<vmem>>, vector<2x32xf32>,
    %288 = vector.extract_strided_slice %192 {offsets = [10, 0], sizes = [2, 128], strides = [1, 1]} : vector<16x128xf32> to vector<2x128xf32>
    %cst_87 = arith.constant dense<0.000000e+00> : vector<2x128xf32>
    %289 = tpu.matmul %286, %185, %cst_87 {dimension_numbers = #tpu.dot_dimension_numbers<[1], [0], [0], [1], [0, 0, 1, 1], [], []>} : vector<2x32xf32>, vector<32x128xf32>, vector<2x128xf32> -> vector<2x128xf32>
    %290 = arith.addf %288, %289 : vector<2x128xf32>
    %291 = arith.negf %290 : vector<2x128xf32>
    %292 = math.exp %291 : vector<2x128xf32>
    %cst_88 = arith.constant 1.000000e+00 : f32
    %293 = vector.broadcast %cst_88 : f32 to vector<2x128xf32>
    %294 = arith.addf %293, %292 : vector<2x128xf32>
    %295 = arith.divf %293, %294 : vector<2x128xf32>
    %296 = math.tanh %290 : vector<2x128xf32>
    %297 = vector.extract_strided_slice %295 {offsets = [0, 0], sizes = [2, 32], strides = [1, 1]} : vector<2x128xf32> to vector<2x32xf32>
    %298 = vector.extract_strided_slice %295 {offsets = [0, 32], sizes = [2, 32], strides = [1, 1]} : vector<2x128xf32> to vector<2x32xf32>
    %299 = vector.extract_strided_slice %296 {offsets = [0, 64], sizes = [2, 32], strides = [1, 1]} : vector<2x128xf32> to vector<2x32xf32>
    %300 = vector.extract_strided_slice %295 {offsets = [0, 96], sizes = [2, 32], strides = [1, 1]} : vector<2x128xf32> to vector<2x32xf32>
    %301 = arith.mulf %298, %284 : vector<2x32xf32>
    %302 = arith.mulf %297, %299 : vector<2x32xf32>
    %303 = arith.addf %301, %302 : vector<2x32xf32>
    %304 = math.tanh %303 : vector<2x32xf32>
    %305 = arith.mulf %300, %304 : vector<2x32xf32>
    %c10_89 = arith.constant 10 : index
    %c0_90 = arith.constant 0 : index
    %306 = vector.load %arg12[%c10_89, %c0_90] : memref<16x32xf32, #tpu.memory_space<vmem>>, vector<2x32xf32>
    tpu.vector_store %arg12[%c10_89, %c0_90], %305 {strides = array<i32>} : memref<16x32xf32, #tpu.memory_space<vmem>>, vector<2x32xf32>,
    %307 = vector.extract_strided_slice %192 {offsets = [12, 0], sizes = [2, 128], strides = [1, 1]} : vector<16x128xf32> to vector<2x128xf32>
    %cst_91 = arith.constant dense<0.000000e+00> : vector<2x128xf32>
    %308 = tpu.matmul %305, %185, %cst_91 {dimension_numbers = #tpu.dot_dimension_numbers<[1], [0], [0], [1], [0, 0, 1, 1], [], []>} : vector<2x32xf32>, vector<32x128xf32>, vector<2x128xf32> -> vector<2x128xf32>
    %309 = arith.addf %307, %308 : vector<2x128xf32>
    %310 = arith.negf %309 : vector<2x128xf32>
    %311 = math.exp %310 : vector<2x128xf32>
    %cst_92 = arith.constant 1.000000e+00 : f32
    %312 = vector.broadcast %cst_92 : f32 to vector<2x128xf32>
    %313 = arith.addf %312, %311 : vector<2x128xf32>
    %314 = arith.divf %312, %313 : vector<2x128xf32>
    %315 = math.tanh %309 : vector<2x128xf32>
    %316 = vector.extract_strided_slice %314 {offsets = [0, 0], sizes = [2, 32], strides = [1, 1]} : vector<2x128xf32> to vector<2x32xf32>
    %317 = vector.extract_strided_slice %314 {offsets = [0, 32], sizes = [2, 32], strides = [1, 1]} : vector<2x128xf32> to vector<2x32xf32>
    %318 = vector.extract_strided_slice %315 {offsets = [0, 64], sizes = [2, 32], strides = [1, 1]} : vector<2x128xf32> to vector<2x32xf32>
    %319 = vector.extract_strided_slice %314 {offsets = [0, 96], sizes = [2, 32], strides = [1, 1]} : vector<2x128xf32> to vector<2x32xf32>
    %320 = arith.mulf %317, %303 : vector<2x32xf32>
    %321 = arith.mulf %316, %318 : vector<2x32xf32>
    %322 = arith.addf %320, %321 : vector<2x32xf32>
    %323 = math.tanh %322 : vector<2x32xf32>
    %324 = arith.mulf %319, %323 : vector<2x32xf32>
    %c12_93 = arith.constant 12 : index
    %c0_94 = arith.constant 0 : index
    %325 = vector.load %arg12[%c12_93, %c0_94] : memref<16x32xf32, #tpu.memory_space<vmem>>, vector<2x32xf32>
    tpu.vector_store %arg12[%c12_93, %c0_94], %324 {strides = array<i32>} : memref<16x32xf32, #tpu.memory_space<vmem>>, vector<2x32xf32>,
    %326 = vector.extract_strided_slice %192 {offsets = [14, 0], sizes = [2, 128], strides = [1, 1]} : vector<16x128xf32> to vector<2x128xf32>
    %cst_95 = arith.constant dense<0.000000e+00> : vector<2x128xf32>
    %327 = tpu.matmul %324, %185, %cst_95 {dimension_numbers = #tpu.dot_dimension_numbers<[1], [0], [0], [1], [0, 0, 1, 1], [], []>} : vector<2x32xf32>, vector<32x128xf32>, vector<2x128xf32> -> vector<2x128xf32>
    %328 = arith.addf %326, %327 : vector<2x128xf32>
    %329 = arith.negf %328 : vector<2x128xf32>
    %330 = math.exp %329 : vector<2x128xf32>
    %cst_96 = arith.constant 1.000000e+00 : f32
    %331 = vector.broadcast %cst_96 : f32 to vector<2x128xf32>
    %332 = arith.addf %331, %330 : vector<2x128xf32>
    %333 = arith.divf %331, %332 : vector<2x128xf32>
    %334 = math.tanh %328 : vector<2x128xf32>
    %335 = vector.extract_strided_slice %333 {offsets = [0, 0], sizes = [2, 32], strides = [1, 1]} : vector<2x128xf32> to vector<2x32xf32>
    %336 = vector.extract_strided_slice %333 {offsets = [0, 32], sizes = [2, 32], strides = [1, 1]} : vector<2x128xf32> to vector<2x32xf32>
    %337 = vector.extract_strided_slice %334 {offsets = [0, 64], sizes = [2, 32], strides = [1, 1]} : vector<2x128xf32> to vector<2x32xf32>
    %338 = vector.extract_strided_slice %333 {offsets = [0, 96], sizes = [2, 32], strides = [1, 1]} : vector<2x128xf32> to vector<2x32xf32>
    %339 = arith.mulf %336, %322 : vector<2x32xf32>
    %340 = arith.mulf %335, %337 : vector<2x32xf32>
    %341 = arith.addf %339, %340 : vector<2x32xf32>
    %342 = math.tanh %341 : vector<2x32xf32>
    %343 = arith.mulf %338, %342 : vector<2x32xf32>
    %c14_97 = arith.constant 14 : index
    %c0_98 = arith.constant 0 : index
    %344 = vector.load %arg12[%c14_97, %c0_98] : memref<16x32xf32, #tpu.memory_space<vmem>>, vector<2x32xf32>
    tpu.vector_store %arg12[%c14_97, %c0_98], %343 {strides = array<i32>} : memref<16x32xf32, #tpu.memory_space<vmem>>, vector<2x32xf32>,
    %c1_99 = arith.constant 1 : index
    %c0_100 = arith.constant 0 : index
    %c0_101 = arith.constant 0 : index
    %345 = vector.load %arg10[%c1_99, %c0_100, %c0_101] : memref<2x2x32xf32, #tpu.memory_space<vmem>>, vector<1x2x32xf32>
    %346 = vector.shape_cast %345 : vector<1x2x32xf32> to vector<2x32xf32>
    %347 = vector.shape_cast %343 : vector<2x32xf32> to vector<1x2x32xf32>
    tpu.vector_store %arg10[%c1_99, %c0_100, %c0_101], %347 {strides = array<i32>} : memref<2x2x32xf32, #tpu.memory_space<vmem>>, vector<1x2x32xf32>,
    %c1_102 = arith.constant 1 : index
    %c0_103 = arith.constant 0 : index
    %c0_104 = arith.constant 0 : index
    %348 = vector.load %arg11[%c1_102, %c0_103, %c0_104] : memref<2x2x32xf32, #tpu.memory_space<vmem>>, vector<1x2x32xf32>
    %349 = vector.shape_cast %348 : vector<1x2x32xf32> to vector<2x32xf32>
    %350 = vector.shape_cast %341 : vector<2x32xf32> to vector<1x2x32xf32>
    tpu.vector_store %arg11[%c1_102, %c0_103, %c0_104], %350 {strides = array<i32>} : memref<2x2x32xf32, #tpu.memory_space<vmem>>, vector<1x2x32xf32>,
    %c0_105 = arith.constant 0 : index
    %c0_106 = arith.constant 0 : index
    %351 = vector.load %arg7[%c0_105, %c0_106] : memref<1x32xf32, #tpu.memory_space<vmem>>, vector<1x32xf32>
    %352 = vector.broadcast %351 : vector<1x32xf32> to vector<2x32xf32>
    %353 = arith.mulf %343, %352 : vector<2x32xf32>
    %cst_107 = arith.constant dense<0.000000e+00> : vector<2xf32>
    %354 = vector.multi_reduction <add>, %353, %cst_107 [1] : vector<2x32xf32> to vector<2xf32>
    %355 = vector.shape_cast %354 : vector<2xf32> to vector<2x1xf32>
    %c0_108 = arith.constant 0 : index
    %c0_109 = arith.constant 0 : index
    %356 = vector.load %arg8[%c0_108, %c0_109] : memref<1x1xf32, #tpu.memory_space<vmem>>, vector<1x1xf32>
    %357 = vector.broadcast %356 : vector<1x1xf32> to vector<2x1xf32>
    %358 = arith.addf %355, %357 : vector<2x1xf32>
    %359 = arith.negf %358 : vector<2x1xf32>
    %360 = math.exp %359 : vector<2x1xf32>
    %cst_110 = arith.constant 1.000000e+00 : f32
    %361 = vector.broadcast %cst_110 : f32 to vector<2x1xf32>
    %362 = arith.addf %361, %360 : vector<2x1xf32>
    %363 = arith.divf %361, %362 : vector<2x1xf32>
    %c0_111 = arith.constant 0 : index
    %c0_112 = arith.constant 0 : index
    %364 = vector.load %arg9[%c0_111, %c0_112] : memref<2x1xf32, #tpu.memory_space<vmem>>, vector<2x1xf32>
    tpu.vector_store %arg9[%c0_111, %c0_112], %363 {strides = array<i32>} : memref<2x1xf32, #tpu.memory_space<vmem>>, vector<2x1xf32>,
    return
  }
}

</mosaic_0001>

<bundles_post_ra>
// kernel: tpu_custom_call.1
= control target key start
LH: loop header
LB: loop body
LE: loop exit
PB: predicated region body
PF: predicated region fallthrough
CT: control target
= control target key end

     0   :  { %s2201_s0 = inlined_call_operand.vmem [shape: s32[16,1], index: 0, kind: input, shape index: {}]   ;;  %s2202_s1 = inlined_call_operand.vmem [shape: f32[64,32], index: 1, kind: input, shape index: {}]   ;;  %s2203_s2 = inlined_call_operand.vmem [shape: f32[2,2,32], index: 2, kind: input, shape index: {}]   ;;  %s2204_s3 = inlined_call_operand.vmem [shape: f32[2,2,32], index: 3, kind: input, shape index: {}]   ;;  %s2205_s4 = inlined_call_operand.vmem [shape: f32[2,32,128], index: 4, kind: input, shape index: {}]   ;;  %s2206_s5 = inlined_call_operand.hbm [shape: f32[2,32,128], index: 5, kind: input, shape index: {}]   ;;  %s2207_s6 = inlined_call_operand.vmem [shape: f32[2,1,128], index: 6, kind: input, shape index: {}]   ;;  %s2208_s7 = inlined_call_operand.vmem [shape: f32[1,32], index: 7, kind: input, shape index: {}]   ;;  %s2209_s8 = inlined_call_operand.<no memory space> [shape: f32[1,1], index: 8, kind: input, shape index: {}]   ;;  %s2210_s9 = inlined_call_operand.vmem [shape: f32[2,1], index: 9, kind: output, shape index: {0}]   ;;  %s2211_s10 = inlined_call_operand.hbm [shape: f32[2,2,32], index: 10, kind: output, shape index: {1}]   ;;  %s2212_s11 = inlined_call_operand.hbm [shape: f32[2,2,32], index: 11, kind: output, shape index: {2}]  }
   0x1   :  { %v17_v0 = vstv %s2209_s8 }
   0x2   :  { %18 = vst [vmem:[#allocation3] sm:$0x1] %v17_v0 }
   0x3   :  { %19 = vsyncpa [#allocation5], 0 }
   0x4   :  { %20 = vsyncpa [#allocation6], 0 }
   0x5   :  { %21 = vsyncpa [#allocation9], 0  ;;  %s36_s21 = sshll.u32 %s2206_s5, 4  ;;  %s1735_s22 = smov [#allocation4]   ;;  %s37_s21 = int_to_ptr.hbm [resolvable:$true] %s36_s21 }
   0x6   :  { %s38_s23 = sshll.u32 %s1735_s22, 4  ;;  %s1736_s24 = smov 128   ;;  %s39_s23 = int_to_ptr.vmem [resolvable:$true] %s38_s23 }
   0x7   :  { %s1737_s25 = smov 8  }
   0x8   :  { %44 = dma.hbm_to_vmem [thread:$0]  %s37_s21, 1024, %s39_s23, [#allocation5], %s1736_s24, %s1736_s24, %s1737_s25  }
   0x9   :  { %1729 = dma.done.wait [#allocation5], 1024  }
   0xa   :  { %1730 = vsyncadd [#allocation5], 4294966272  ;;  %v1738_v1 = vmov 0   ;;  %v55_v2 = vld [vmem:[%s2201_s0] sm:$0xff]  ;;  %v78_v3 = vld [vmem:[%s2202_s1 + $0x38] sm:$0xff]  ;;  %vm123_vm0 = vcmask 261120   ;;  %v57_v19 = vlaneseq }
   0xb   :  { %1519 = vset.pattern.permute.xlu0 %v1738_v1  ;;  %1520 = vset.pattern.permute.xlu2 %v1738_v1  ;;  %v77_v4 = vld [vmem:[%s2202_s1 + $0x30] sm:$0xff]  ;;  %v76_v5 = vld [vmem:[%s2202_s1 + $0x28] sm:$0xff]  ;;  %v75_v6 = vld [vmem:[%s2202_s1 + $0x20] sm:$0xff]  ;;  %vm79_vm1 = vcmask 523264   ;;  %v1739_v22 = vmov 0.0   ;;  %s1740_s13 = smov 32  }
   0xc   :  { %60 = vperm.xlu0 %1519, %v55_v2   ;;  %94 = vmatpush.msra.mxu0 %v78_v3  ;;  %v74_v7 = vld [vmem:[%s2202_s1 + $0x18] sm:$0xff]  ;;  %v73_v8 = vld [vmem:[%s2202_s1 + $0x10] sm:$0xff]  ;;  %v72_v9 = vld [vmem:[%s2202_s1 + $0x8] sm:$0xff]  ;;  %v1884_v20 = vand.u32 127, %v57_v19  ;;  %s1741_s16 = smov 64   ;;  %vm222_vm7 = vcmask 254976  }
   0xd   :  { %v71_v10 = vld [vmem:[%s2202_s1] sm:$0xff]  ;;  %v1839_v11 = vld [vmem:[#allocation4 + $0x18] sm:$0xff]  ;;  %v118_v13 = vld [vmem:[%s2205_s4 + $0x18] sm:$0xff]  ;;  %s1742_s28 = smov 96   ;;  %s1427_s12 = sshll.u32 %s2211_s10, 4  ;;  %s1428_s12 = int_to_ptr.hbm [resolvable:$true] %s1427_s12 }
   0xe   :  { %95 = vmatpush.msra.mxu0 %v77_v4  ;;  %v1841_v12 = vld [vmem:[#allocation4 + $0x10] sm:$0xff]  ;;  %168 = vmatpush.msra.mxu2 %v1839_v11  ;;  %v117_v14 = vld [vmem:[%s2205_s4 + $0x10] sm:$0xff]  ;;  %v1850_v15 = vld [vmem:[#allocation4 + $0x8] sm:$0xff]  ;;  %s1744_s14 = smov [#allocation8]  }
   0xf   :  { %142 = vmatpush.msra.mxu1 %v118_v13  ;;  %v116_v16 = vld [vmem:[%s2205_s4 + $0x8] sm:$0xff]  ;;  %238 = vmatpush.msra.mxu3 %v1839_v11  ;;  %v1858_v17 = vld [vmem:[#allocation4] sm:$0xff]  ;;  %v109_v18 = vld [vmem:[%s2203_s2] sm:$0x3]  ;;  %s1438_s15 = sshll.u32 %s1744_s14, 4  ;;  %s1439_s15 = int_to_ptr.vmem [resolvable:$true] %s1438_s15 }
  0x10   :  { %96 = vmatpush.msra.mxu0 %v76_v5  ;;  %169 = vmatpush.msra.mxu2 %v1841_v12  ;;  %v115_v24 = vld [vmem:[%s2205_s4] sm:$0xff] }
  0x11   :  { %143 = vmatpush.msra.mxu1 %v117_v14  ;;  %239 = vmatpush.msra.mxu3 %v1841_v12  ;;  %v110_v25 = vld [vmem:[%s2204_s3] sm:$0x3] }
  0x12   :  { %97 = vmatpush.msra.mxu0 %v75_v6  ;;  %170 = vmatpush.msra.mxu2 %v1850_v15  ;;  %v1904_v27 = vld [vmem:[%s2207_s6] ss:$0 sm:$0xff] }
  0x13   :  { %144 = vmatpush.msra.mxu1 %v116_v16  ;;  %240 = vmatpush.msra.mxu3 %v1850_v15 }
  0x14   :  { %98 = vmatpush.msra.mxu0 %v74_v7  ;;  %171 = vmatpush.msra.mxu2 %v1858_v17 }
  0x15   :  { %1466 = vmatmul.msk.f32.vlgmr.msra.gmra.mxu2 %vm123_vm0, %v109_v18  ;;  %241 = vmatpush.msra.mxu3 %v1858_v17 }
  0x16   :  { %99 = vmatpush.msra.mxu0 %v73_v8  ;;  %313 = vmatpush.msrb.mxu2 %v1839_v11 }
  0x17   :  { %388 = vmatpush.msrb.mxu3 %v1839_v11  ;;  %145 = vmatpush.msra.mxu1 %v115_v24 }
  0x18   :  { %100 = vmatpush.msra.mxu0 %v72_v9  ;;  %314 = vmatpush.msrb.mxu2 %v1841_v12 }
  0x19   :  { %389 = vmatpush.msrb.mxu3 %v1841_v12  ;;  %463 = vmatpush.msrb.mxu1 %v1839_v11 }
  0x1a   :  { %101 = vmatpush.msra.mxu0 %v71_v10  ;;  %315 = vmatpush.msrb.mxu2 %v1850_v15 }
  0x1b   :  { %390 = vmatpush.msrb.mxu3 %v1850_v15  ;;  %198 = vrot.lane.b32.xlu1 %v110_v25, %s1740_s13 }
  0x1c   :  { %679 = vmatpush.msrb.mxu0 %v1839_v11  ;;  %316 = vmatpush.msrb.mxu2 %v1858_v17 }
  0x1d   :  { %391 = vmatpush.msrb.mxu3 %v1858_v17  ;;  %464 = vmatpush.msrb.mxu1 %v1841_v12 }
  0x1e   :  { %680 = vmatpush.msrb.mxu0 %v1841_v12  ;;  %531 = vmatpush.msra.mxu2 %v1839_v11 }
  0x1f   :  { %465 = vmatpush.msrb.mxu1 %v1850_v15 }
  0x20   :  { %681 = vmatpush.msrb.mxu0 %v1850_v15  ;;  %532 = vmatpush.msra.mxu2 %v1841_v12 }
  0x21   :  { %466 = vmatpush.msrb.mxu1 %v1858_v17 }
  0x22   :  { %682 = vmatpush.msrb.mxu0 %v1858_v17  ;;  %533 = vmatpush.msra.mxu2 %v1850_v15 }
  0x24   :  { %534 = vmatpush.msra.mxu2 %v1858_v17 }
  0x7e   :  { %v61_v21 = vpop.permute.xlu0 %60 }
  0x7f   :  { %vm65_vm2 = vcmp.eq.s32.totalorder %v1884_v20, %v61_v21 }
  0x80   :  { %v1460_v23 = vsel %vm65_vm2, 1.0, %v1739_v22 }
  0x81   :  { %1462 = vmatmul.msk.f32.vlgmr.msra.gmra.mxu0 %vm79_vm1, %v1460_v23 }
  0x8d   :  { %v199_v48 = vpop.permute.xlu1 %198 }
  0x98   :  { %v173_v29 = vpop.f32.mrf.mxu2 }
  0xfe   :  { %v103_v26 = vpop.f32.mrf.mxu0 }
  0xff   :  { %1464 = vmatmul.msk.f32.vlgmr.msra.gmra.mxu1 %vm123_vm0, %v103_v26 }
 0x17c   :  { %v147_v28 = vpop.f32.mrf.mxu1 }
 0x17d   :  { %v1907_v30 = vadd.f32 %v1904_v27, %v147_v28 }
 0x17f   :  { %v176_v31 = vadd.f32 %v173_v29, %v1907_v30 }
 0x181   :  { %1525 = vtanh.f32 %v176_v31  ;;  %v1467_v33 = vmul.f32 -1.442695, %v176_v31 }
 0x183   :  { %1527 = vpow2.f32 %v1467_v33 }
 0x187   :  { %v1526_v32 = vpop.eup %1525 }
 0x188   :  { %203 = vrot.lane.b32.xlu0 %v1526_v32, %s1741_s16 }
 0x189   :  { %v1528_v34 = vpop.eup %1527 }
 0x18a   :  { %v180_v35 = vadd.f32 1.0, %v1528_v34 }
 0x18c   :  { %1529 = vrcp.f32 %v180_v35  ;;  %v192_v41 = vand.u32 2147483648, %v180_v35  ;;  %vm186_vm4 = vweird.f32 %v180_v35  ;;  %v190_v42 = vand.u32 2147483647, %v180_v35 }
 0x18e   :  { %v193_v44 = vor.u32 1.1754944e-38, %v192_v41  ;;  %vm191_vm6 = vcmp.eq.f32.partialorder %v190_v42, 8.507059e+37 }
 0x192   :  { %v1530_v36 = vpop.eup %1529 }
 0x193   :  { %v182_v37 = vmul.f32 %v1530_v36, %v180_v35  ;;  %vm187_vm3 = vweird.f32 %v1530_v36 }
 0x194   :  { %vm188_vm5 = vmor %vm186_vm4, %vm187_vm3 }
 0x195   :  { %v183_v38 = vsub.f32 1.0, %v182_v37 }
 0x197   :  { %v184_v39 = vmul.f32 %v1530_v36, %v183_v38 }
 0x199   :  { %v185_v40 = vadd.f32 %v1530_v36, %v184_v39 }
 0x19b   :  { %v189_v43 = vsel %vm188_vm5, %v1530_v36, %v185_v40 }
 0x19c   :  { %v194_v45 = vsel %vm191_vm6, %v193_v44, %v189_v43 }
 0x19d   :  { %v201_v49 = vmul.f32 %v199_v48, %v194_v45 }
 0x1fa   :  { %v204_v46 = vpop.permute.xlu0 %203 }
 0x1fb   :  { %v206_v47 = vmul.f32 %v204_v46, %v194_v45 }
 0x1fd   :  { %208 = vrot.lane.b32.xlu1 %v206_v47, %s1740_s13 }
 0x26f   :  { %v209_v50 = vpop.permute.xlu1 %208 }
 0x270   :  { %v211_v51 = vadd.f32 %v209_v50, %v201_v49 }
 0x272   :  { %1531 = vtanh.f32 %v211_v51 }
 0x278   :  { %v1532_v52 = vpop.eup %1531 }
 0x279   :  { %214 = vrot.lane.b32.xlu2 %v1532_v52, %s1741_s16 }
 0x2d3   :  { %v215_v53 = vpop.permute.xlu2 %214 }
 0x2d4   :  { %v217_v54 = vmul.f32 %v215_v53, %v194_v45 }
 0x2d6   :  { %219 = vrot.lane.b32.xlu2 %v217_v54, %s1740_s13 }
 0x330   :  { %v220_v55 = vpop.permute.xlu2 %219 }
 0x331   :  { %223 = vst.msk [vmem:[#allocation2] sm:$0x3] %vm222_vm7, %v220_v55  ;;  %1468 = vmatmul.msk.f32.vlgmr.msra.gmra.mxu3 %vm123_vm0, %v220_v55 }
 0x332   :  { %605 = vmatpush.msra.mxu3 %v1839_v11  ;;  %v271_v11 = vrot.slane %v211_v51, 6 }
 0x334   :  { %606 = vmatpush.msra.mxu3 %v1841_v12 }
 0x336   :  { %607 = vmatpush.msra.mxu3 %v1850_v15 }
 0x338   :  { %608 = vmatpush.msra.mxu3 %v1858_v17 }
 0x3b4   :  { %v243_v56 = vpop.f32.mrf.mxu3 }
 0x3b5   :  { %v247_v57 = vrot.slane %v243_v56, 6 }
 0x3b7   :  { %v249_v58 = vadd.f32 %v247_v57, %v1907_v30 }
 0x3b9   :  { %1533 = vtanh.f32 %v249_v58  ;;  %v1469_v60 = vmul.f32 -1.442695, %v249_v58 }
 0x3bb   :  { %1535 = vpow2.f32 %v1469_v60 }
 0x3bf   :  { %v1534_v59 = vpop.eup %1533 }
 0x3c0   :  { %275 = vrot.lane.b32.xlu0 %v1534_v59, %s1741_s16  ;;  %v56_v59 = vld [vmem:[%s2201_s0 + $0x8] sm:$0xff]  ;;  %s1440_s0 = sshll.u32 %s2212_s11, 4  ;;  %s1441_s0 = int_to_ptr.hbm [resolvable:$true] %s1440_s0 }
 0x3c1   :  { %v1536_v61 = vpop.eup %1535 }
 0x3c2   :  { %v253_v62 = vadd.f32 1.0, %v1536_v61 }
 0x3c4   :  { %1537 = vrcp.f32 %v253_v62  ;;  %v265_v4 = vand.u32 2147483648, %v253_v62  ;;  %vm259_vm9 = vweird.f32 %v253_v62  ;;  %v263_v5 = vand.u32 2147483647, %v253_v62 }
 0x3c6   :  { %v266_v7 = vor.u32 1.1754944e-38, %v265_v4  ;;  %vm264_vm11 = vcmp.eq.f32.partialorder %v263_v5, 8.507059e+37 }
 0x3ca   :  { %v1538_v63 = vpop.eup %1537 }
 0x3cb   :  { %v255_v0 = vmul.f32 %v1538_v63, %v253_v62  ;;  %vm260_vm8 = vweird.f32 %v1538_v63 }
 0x3cc   :  { %vm261_vm10 = vmor %vm259_vm9, %vm260_vm8 }
 0x3cd   :  { %v256_v1 = vsub.f32 1.0, %v255_v0 }
 0x3cf   :  { %v257_v2 = vmul.f32 %v1538_v63, %v256_v1 }
 0x3d1   :  { %v258_v3 = vadd.f32 %v1538_v63, %v257_v2 }
 0x3d3   :  { %v262_v6 = vsel %vm261_vm10, %v1538_v63, %v258_v3 }
 0x3d4   :  { %v267_v9 = vsel %vm264_vm11, %v266_v7, %v262_v6  ;;  %vm294_vm11 = vcmask 257026  }
 0x3d5   :  { %v273_v12 = vmul.f32 %v271_v11, %v267_v9 }
 0x432   :  { %v276_v8 = vpop.permute.xlu0 %275 }
 0x433   :  { %v278_v10 = vmul.f32 %v276_v8, %v267_v9 }
 0x435   :  { %280 = vrot.lane.b32.xlu1 %v278_v10, %s1740_s13 }
 0x4a7   :  { %v281_v13 = vpop.permute.xlu1 %280 }
 0x4a8   :  { %v283_v14 = vadd.f32 %v281_v13, %v273_v12 }
 0x4aa   :  { %1539 = vtanh.f32 %v283_v14  ;;  %v346_v43 = vrot.slane %v283_v14, 6 }
 0x4b0   :  { %v1540_v15 = vpop.eup %1539 }
 0x4b1   :  { %286 = vrot.lane.b32.xlu2 %v1540_v15, %s1741_s16 }
 0x50b   :  { %v287_v16 = vpop.permute.xlu2 %286 }
 0x50c   :  { %v1924_v17 = vmul.f32 %v287_v16, %v267_v9 }
 0x50e   :  { %v296_v18 = vrot.slane %v1924_v17, 2 }
 0x510   :  { %297 = vrot.lane.b32.xlu0 %v296_v18, %s1740_s13 }
 0x582   :  { %v298_v19 = vpop.permute.xlu0 %297 }
 0x583   :  { %1470 = vmatmul.msk.f32.vlgmr.msrb.gmra.mxu2 %vm123_vm0, %v298_v19 }
 0x606   :  { %v318_v21 = vpop.f32.mrf.mxu2 }
 0x607   :  { %v322_v23 = vrot.slane %v318_v21, 4 }
 0x609   :  { %v324_v24 = vadd.f32 %v322_v23, %v1907_v30 }
 0x60b   :  { %1541 = vtanh.f32 %v324_v24  ;;  %v1471_v26 = vmul.f32 -1.442695, %v324_v24 }
 0x60d   :  { %1543 = vpow2.f32 %v1471_v26 }
 0x611   :  { %v1542_v25 = vpop.eup %1541 }
 0x612   :  { %350 = vrot.lane.b32.xlu1 %v1542_v25, %s1741_s16 }
 0x613   :  { %v1544_v28 = vpop.eup %1543 }
 0x614   :  { %v328_v29 = vadd.f32 1.0, %v1544_v28 }
 0x616   :  { %1545 = vrcp.f32 %v328_v29  ;;  %v340_v36 = vand.u32 2147483648, %v328_v29  ;;  %vm334_vm13 = vweird.f32 %v328_v29  ;;  %v338_v37 = vand.u32 2147483647, %v328_v29 }
 0x618   :  { %v341_v39 = vor.u32 1.1754944e-38, %v340_v36  ;;  %vm339_vm15 = vcmp.eq.f32.partialorder %v338_v37, 8.507059e+37 }
 0x61c   :  { %v1546_v31 = vpop.eup %1545 }
 0x61d   :  { %v330_v32 = vmul.f32 %v1546_v31, %v328_v29  ;;  %vm335_vm12 = vweird.f32 %v1546_v31 }
 0x61e   :  { %vm336_vm14 = vmor %vm334_vm13, %vm335_vm12  ;;  %vm369_vm12 = vcmask 259076   ;;  %vm444_vm13 = vcmask 261126  }
 0x61f   :  { %v331_v33 = vsub.f32 1.0, %v330_v32 }
 0x621   :  { %v332_v34 = vmul.f32 %v1546_v31, %v331_v33 }
 0x623   :  { %v333_v35 = vadd.f32 %v1546_v31, %v332_v34 }
 0x625   :  { %v337_v38 = vsel %vm336_vm14, %v1546_v31, %v333_v35 }
 0x626   :  { %v342_v41 = vsel %vm339_vm15, %v341_v39, %v337_v38 }
 0x627   :  { %v348_v44 = vmul.f32 %v346_v43, %v342_v41 }
 0x684   :  { %v351_v40 = vpop.permute.xlu1 %350 }
 0x685   :  { %v353_v42 = vmul.f32 %v351_v40, %v342_v41 }
 0x687   :  { %355 = vrot.lane.b32.xlu2 %v353_v42, %s1740_s13 }
 0x68f   :  { %63 = vperm.xlu2 %1520, %v56_v59  }
 0x6e1   :  { %v356_v45 = vpop.permute.xlu2 %355 }
 0x6e2   :  { %v358_v46 = vadd.f32 %v356_v45, %v348_v44 }
 0x6e4   :  { %1547 = vtanh.f32 %v358_v46  ;;  %v421_v9 = vrot.slane %v358_v46, 6 }
 0x6e9   :  { %v64_v7 = vpop.permute.xlu2 %63 }
 0x6ea   :  { %v1548_v47 = vpop.eup %1547  ;;  %vm66_vm6 = vcmp.eq.s32.totalorder %v1884_v20, %v64_v7 }
 0x6eb   :  { %361 = vrot.lane.b32.xlu0 %v1548_v47, %s1741_s16  ;;  %v1461_v8 = vsel %vm66_vm6, 1.0, %v1739_v22 }
 0x6ec   :  { %1463 = vmatmul.msk.f32.gmra.mxu0 %vm79_vm1, %v1461_v8 }
 0x75d   :  { %v362_v48 = vpop.permute.xlu0 %361 }
 0x75e   :  { %v1933_v49 = vmul.f32 %v362_v48, %v342_v41 }
 0x760   :  { %v371_v50 = vrot.slane %v1933_v49, 4 }
 0x762   :  { %372 = vrot.lane.b32.xlu1 %v371_v50, %s1740_s13  ;;  %v1969_v50 = vld [vmem:[#allocation4 + $0x38] sm:$0xff] }
 0x763   :  { %807 = vmatpush.msrb.mxu2 %v1969_v50  ;;  %950 = vmatpush.msra.mxu0 %v1969_v50 }
 0x769   :  { %v106_v18 = vpop.f32.mrf.mxu0 }
 0x76a   :  { %1465 = vmatmul.msk.f32.gmra.mxu1 %vm123_vm0, %v106_v18 }
 0x7d4   :  { %v373_v51 = vpop.permute.xlu1 %372 }
 0x7d5   :  { %1472 = vmatmul.msk.f32.vlgmr.msrb.gmra.mxu3 %vm123_vm0, %v373_v51  ;;  %v1971_v51 = vld [vmem:[#allocation4 + $0x30] sm:$0xff] }
 0x7d6   :  { %876 = vmatpush.msrb.mxu3 %v1969_v50  ;;  %808 = vmatpush.msrb.mxu2 %v1971_v51 }
 0x7d7   :  { %951 = vmatpush.msra.mxu0 %v1971_v51 }
 0x7d8   :  { %877 = vmatpush.msrb.mxu3 %v1971_v51 }
 0x7e7   :  { %v150_v22 = vpop.f32.mrf.mxu1 }
 0x7e8   :  { %v1952_v19 = vadd.f32 %v1904_v27, %v150_v22 }
 0x858   :  { %v393_v52 = vpop.f32.mrf.mxu3 }
 0x859   :  { %v397_v53 = vrot.slane %v393_v52, 2  ;;  %v1982_v52 = vld [vmem:[#allocation4 + $0x28] sm:$0xff] }
 0x85a   :  { %809 = vmatpush.msrb.mxu2 %v1982_v52  ;;  %878 = vmatpush.msrb.mxu3 %v1982_v52 }
 0x85b   :  { %v399_v54 = vadd.f32 %v397_v53, %v1907_v30  ;;  %v1486_v53 = vld [vmem:[%s2205_s4 + $0x30] sm:$0xff]  ;;  %952 = vmatpush.msra.mxu0 %v1982_v52 }
 0x85d   :  { %1549 = vtanh.f32 %v399_v54  ;;  %v1473_v56 = vmul.f32 -1.442695, %v399_v54  ;;  %v1988_v54 = vld [vmem:[#allocation4 + $0x20] sm:$0xff] }
 0x85e   :  { %810 = vmatpush.msrb.mxu2 %v1988_v54  ;;  %879 = vmatpush.msrb.mxu3 %v1988_v54 }
 0x85f   :  { %1551 = vpow2.f32 %v1473_v56  ;;  %v1484_v56 = vld [vmem:[%s2205_s4 + $0x20] sm:$0xff]  ;;  %953 = vmatpush.msra.mxu0 %v1988_v54 }
 0x863   :  { %v1550_v55 = vpop.eup %1549 }
 0x864   :  { %425 = vrot.lane.b32.xlu0 %v1550_v55, %s1741_s16  ;;  %v1485_v55 = vld [vmem:[%s2205_s4 + $0x28] sm:$0xff] }
 0x865   :  { %v1552_v57 = vpop.eup %1551 }
 0x866   :  { %v403_v58 = vadd.f32 1.0, %v1552_v57 }
 0x868   :  { %1553 = vrcp.f32 %v403_v58  ;;  %v415_v30 = vand.u32 2147483648, %v403_v58  ;;  %vm409_vm3 = vweird.f32 %v403_v58  ;;  %v413_v1 = vand.u32 2147483647, %v403_v58 }
 0x86a   :  { %v416_v3 = vor.u32 1.1754944e-38, %v415_v30  ;;  %vm414_vm5 = vcmp.eq.f32.partialorder %v413_v1, 8.507059e+37 }
 0x86e   :  { %v1554_v60 = vpop.eup %1553 }
 0x86f   :  { %v405_v61 = vmul.f32 %v1554_v60, %v403_v58  ;;  %vm410_vm2 = vweird.f32 %v1554_v60  ;;  %v1482_v58 = vld [vmem:[%s2203_s2 + $0x2] sm:$0x3] }
 0x870   :  { %vm411_vm4 = vmor %vm409_vm3, %vm410_vm2 }
 0x871   :  { %v406_v62 = vsub.f32 1.0, %v405_v61 }
 0x873   :  { %v407_v63 = vmul.f32 %v1554_v60, %v406_v62 }
 0x875   :  { %v408_v0 = vadd.f32 %v1554_v60, %v407_v63 }
 0x877   :  { %v412_v2 = vsel %vm411_vm4, %v1554_v60, %v408_v0  ;;  %v2025_v0 = vld [vmem:[%s2207_s6 + $0x1] ss:$0 sm:$0xff] }
 0x878   :  { %v417_v5 = vsel %vm414_vm5, %v416_v3, %v412_v2 }
 0x879   :  { %v423_v10 = vmul.f32 %v421_v9, %v417_v5 }
 0x8d6   :  { %v426_v4 = vpop.permute.xlu0 %425 }
 0x8d7   :  { %v428_v6 = vmul.f32 %v426_v4, %v417_v5 }
 0x8d9   :  { %430 = vrot.lane.b32.xlu1 %v428_v6, %s1740_s13 }
 0x94b   :  { %v431_v11 = vpop.permute.xlu1 %430 }
 0x94c   :  { %v433_v12 = vadd.f32 %v431_v11, %v423_v10 }
 0x94e   :  { %1555 = vtanh.f32 %v433_v12  ;;  %v493_v41 = vrot.slane %v433_v12, 6 }
 0x954   :  { %v1556_v13 = vpop.eup %1555 }
 0x955   :  { %436 = vrot.lane.b32.xlu2 %v1556_v13, %s1741_s16 }
 0x9af   :  { %v437_v14 = vpop.permute.xlu2 %436 }
 0x9b0   :  { %v439_v15 = vmul.f32 %v437_v14, %v417_v5  ;;  %v1483_v5 = vld [vmem:[%s2204_s3 + $0x2] sm:$0x3] }
 0x9b2   :  { %v446_v16 = vrot.slane %v439_v15, 6 }
 0x9b4   :  { %447 = vrot.lane.b32.xlu0 %v446_v16, %s1740_s13 }
 0xa26   :  { %v448_v20 = vpop.permute.xlu0 %447 }
 0xa27   :  { %1474 = vmatmul.msk.f32.vlgmr.msrb.gmra.mxu1 %vm123_vm0, %v448_v20 }
 0xaa4   :  { %v468_v21 = vpop.f32.mrf.mxu1 }
 0xaa5   :  { %v471_v23 = vadd.f32 %v468_v21, %v1952_v19 }
 0xaa7   :  { %1557 = vtanh.f32 %v471_v23  ;;  %v1475_v25 = vmul.f32 -1.442695, %v471_v23 }
 0xaa9   :  { %1559 = vpow2.f32 %v1475_v25 }
 0xaad   :  { %v1558_v24 = vpop.eup %1557 }
 0xaae   :  { %497 = vrot.lane.b32.xlu1 %v1558_v24, %s1741_s16 }
 0xaaf   :  { %v1560_v26 = vpop.eup %1559 }
 0xab0   :  { %v475_v28 = vadd.f32 1.0, %v1560_v26 }
 0xab2   :  { %1561 = vrcp.f32 %v475_v28  ;;  %v487_v27 = vand.u32 2147483648, %v475_v28  ;;  %vm481_vm8 = vweird.f32 %v475_v28  ;;  %v485_v35 = vand.u32 2147483647, %v475_v28 }
 0xab4   :  { %v488_v37 = vor.u32 1.1754944e-38, %v487_v27  ;;  %vm486_vm10 = vcmp.eq.f32.partialorder %v485_v35, 8.507059e+37 }
 0xab8   :  { %v1562_v29 = vpop.eup %1561 }
 0xab9   :  { %v477_v31 = vmul.f32 %v1562_v29, %v475_v28  ;;  %vm482_vm1 = vweird.f32 %v1562_v29 }
 0xaba   :  { %vm483_vm9 = vmor %vm481_vm8, %vm482_vm1 }
 0xabb   :  { %v478_v32 = vsub.f32 1.0, %v477_v31 }
 0xabd   :  { %v479_v33 = vmul.f32 %v1562_v29, %v478_v32 }
 0xabf   :  { %v480_v34 = vadd.f32 %v1562_v29, %v479_v33 }
 0xac1   :  { %v484_v36 = vsel %vm483_vm9, %v1562_v29, %v480_v34 }
 0xac2   :  { %v489_v39 = vsel %vm486_vm10, %v488_v37, %v484_v36 }
 0xac3   :  { %v495_v42 = vmul.f32 %v493_v41, %v489_v39 }
 0xb20   :  { %v498_v38 = vpop.permute.xlu1 %497 }
 0xb21   :  { %v500_v40 = vmul.f32 %v498_v38, %v489_v39 }
 0xb23   :  { %502 = vrot.lane.b32.xlu2 %v500_v40, %s1740_s13 }
 0xb2b   :  { %291 = vrot.lane.b32.xlu2 %v1924_v17, %s1740_s13 }
 0xb7d   :  { %v503_v43 = vpop.permute.xlu2 %502 }
 0xb7e   :  { %v1959_v44 = vadd.f32 %v503_v43, %v495_v42 }
 0xb80   :  { %1563 = vtanh.f32 %v1959_v44  ;;  %v564_v40 = vrot.slane %v1959_v44, 6 }
 0xb85   :  { %v292_v45 = vpop.permute.xlu2 %291 }
 0xb86   :  { %v1564_v46 = vpop.eup %1563  ;;  %295 = vst.msk [vmem:[#allocation2] sm:$0xc] %vm294_vm11, %v292_v45 }
 0xb87   :  { %508 = vrot.lane.b32.xlu0 %v1564_v46, %s1741_s16 }
 0xb8f   :  { %366 = vrot.lane.b32.xlu0 %v1933_v49, %s1740_s13  ;;  %v1487_v49 = vld [vmem:[%s2205_s4 + $0x38] sm:$0xff] }
 0xb90   :  { %781 = vmatpush.msra.mxu1 %v1487_v49 }
 0xb92   :  { %782 = vmatpush.msra.mxu1 %v1486_v53 }
 0xb94   :  { %783 = vmatpush.msra.mxu1 %v1485_v55 }
 0xb96   :  { %784 = vmatpush.msra.mxu1 %v1484_v56 }
 0xb98   :  { %1240 = vmatpush.msrb.mxu1 %v1969_v50 }
 0xb9a   :  { %1241 = vmatpush.msrb.mxu1 %v1971_v51 }
 0xb9c   :  { %1242 = vmatpush.msrb.mxu1 %v1982_v52 }
 0xb9e   :  { %1243 = vmatpush.msrb.mxu1 %v1988_v54 }
 0xbf9   :  { %v509_v47 = vpop.permute.xlu0 %508 }
 0xbfa   :  { %v511_v48 = vmul.f32 %v509_v47, %v489_v39 }
 0xbfc   :  { %513 = vrot.lane.b32.xlu1 %v511_v48, %s1740_s13 }
 0xc01   :  { %v367_v17 = vpop.permute.xlu0 %366 }
 0xc02   :  { %370 = vst.msk [vmem:[#allocation2] sm:$0x30] %vm369_vm12, %v367_v17 }
 0xc04   :  { %441 = vrot.lane.b32.xlu1 %v439_v15, %s1740_s13 }
 0xc6e   :  { %v514_v57 = vpop.permute.xlu1 %513 }
 0xc6f   :  { %516 = vst.msk [vmem:[#allocation2 + $0x8] sm:$0x3] %vm222_vm7, %v514_v57  ;;  %1476 = vmatmul.msk.f32.vlgmr.msra.gmra.mxu2 %vm123_vm0, %v514_v57 }
 0xc70   :  { %1024 = vmatpush.msra.mxu2 %v1969_v50 }
 0xc72   :  { %1025 = vmatpush.msra.mxu2 %v1971_v51 }
 0xc74   :  { %1026 = vmatpush.msra.mxu2 %v1982_v52 }
 0xc76   :  { %v442_v59 = vpop.permute.xlu1 %441  ;;  %1027 = vmatpush.msra.mxu2 %v1988_v54 }
 0xc77   :  { %445 = vst.msk [vmem:[#allocation2] sm:$0xc0] %vm444_vm13, %v442_v59  ;;  %1491 = vmatmul.msk.f32.vlgmr.msrb.gmra.mxu2 %vm123_vm0, %v1482_v58 }
 0xc78   :  { %1314 = vmatpush.msrb.mxu2 %v1969_v50 }
 0xc7a   :  { %1315 = vmatpush.msrb.mxu2 %v1971_v51 }
 0xc7c   :  { %1316 = vmatpush.msrb.mxu2 %v1982_v52 }
 0xc7e   :  { %v742_v60 = vld [vmem:[#allocation2] sm:$0xff]  ;;  %1317 = vmatpush.msrb.mxu2 %v1988_v54 }
 0xc7f   :  { %1489 = vmatmul.msk.f32.vlgmr.msra.gmra.mxu1 %vm123_vm0, %v742_v60 }
 0xcf2   :  { %v536_v61 = vpop.f32.mrf.mxu2 }
 0xcf3   :  { %v540_v62 = vrot.slane %v536_v61, 6 }
 0xcf5   :  { %v542_v63 = vadd.f32 %v540_v62, %v1952_v19 }
 0xcf7   :  { %1565 = vtanh.f32 %v542_v63  ;;  %v1477_v7 = vmul.f32 -1.442695, %v542_v63 }
 0xcfa   :  { %v812_v1 = vpop.f32.mrf.mxu2 }
 0xcfc   :  { %v786_v30 = vpop.f32.mrf.mxu1 }
 0xcfd   :  { %v1566_v2 = vpop.eup %1565  ;;  %v2028_v3 = vadd.f32 %v2025_v0, %v786_v30 }
 0xcfe   :  { %568 = vrot.lane.b32.xlu2 %v1566_v2, %s1741_s16 }
 0xcff   :  { %v815_v4 = vadd.f32 %v812_v1, %v2028_v3 }
 0xd01   :  { %1567 = vtanh.f32 %v815_v4  ;;  %v1492_v13 = vmul.f32 -1.442695, %v815_v4 }
 0xd02   :  { %1569 = vpow2.f32 %v1477_v7 }
 0xd06   :  { %837 = vrot.lane.b32.xlu2 %v1483_v5, %s1740_s13 }
 0xd07   :  { %v1568_v6 = vpop.eup %1567 }
 0xd08   :  { %842 = vrot.lane.b32.xlu0 %v1568_v6, %s1741_s16  ;;  %v1570_v8 = vpop.eup %1569 }
 0xd09   :  { %v546_v9 = vadd.f32 1.0, %v1570_v8 }
 0xd0b   :  { %1571 = vrcp.f32 %v546_v9  ;;  %v558_v16 = vand.u32 2147483648, %v546_v9  ;;  %vm552_vm15 = vweird.f32 %v546_v9  ;;  %v556_v18 = vand.u32 2147483647, %v546_v9 }
 0xd0c   :  { %1573 = vpow2.f32 %v1492_v13 }
 0xd0d   :  { %v559_v22 = vor.u32 1.1754944e-38, %v558_v16  ;;  %vm557_vm3 = vcmp.eq.f32.partialorder %v556_v18, 8.507059e+37 }
 0xd11   :  { %v1572_v10 = vpop.eup %1571 }
 0xd12   :  { %v548_v11 = vmul.f32 %v1572_v10, %v546_v9  ;;  %vm553_vm14 = vweird.f32 %v1572_v10  ;;  %v1574_v21 = vpop.eup %1573 }
 0xd13   :  { %vm554_vm2 = vmor %vm552_vm15, %vm553_vm14  ;;  %v819_v26 = vadd.f32 1.0, %v1574_v21 }
 0xd14   :  { %v549_v12 = vsub.f32 1.0, %v548_v11 }
 0xd15   :  { %1575 = vrcp.f32 %v819_v26  ;;  %v831_v34 = vand.u32 2147483648, %v819_v26  ;;  %vm825_vm5 = vweird.f32 %v819_v26  ;;  %v829_v27 = vand.u32 2147483647, %v819_v26 }
 0xd16   :  { %v550_v14 = vmul.f32 %v1572_v10, %v549_v12 }
 0xd17   :  { %v832_v36 = vor.u32 1.1754944e-38, %v831_v34  ;;  %vm830_vm1 = vcmp.eq.f32.partialorder %v829_v27, 8.507059e+37 }
 0xd18   :  { %v551_v15 = vadd.f32 %v1572_v10, %v550_v14 }
 0xd1a   :  { %v555_v20 = vsel %vm554_vm2, %v1572_v10, %v551_v15 }
 0xd1b   :  { %v560_v24 = vsel %vm557_vm3, %v559_v22, %v555_v20  ;;  %v1576_v28 = vpop.eup %1575 }
 0xd1c   :  { %v821_v29 = vmul.f32 %v1576_v28, %v819_v26  ;;  %vm826_vm4 = vweird.f32 %v1576_v28  ;;  %v566_v41 = vmul.f32 %v564_v40, %v560_v24 }
 0xd1d   :  { %vm827_vm6 = vmor %vm825_vm5, %vm826_vm4 }
 0xd1e   :  { %v822_v31 = vsub.f32 1.0, %v821_v29 }
 0xd20   :  { %v823_v32 = vmul.f32 %v1576_v28, %v822_v31 }
 0xd22   :  { %v824_v33 = vadd.f32 %v1576_v28, %v823_v32 }
 0xd24   :  { %v828_v35 = vsel %vm827_vm6, %v1576_v28, %v824_v33 }
 0xd25   :  { %v833_v37 = vsel %vm830_vm1, %v832_v36, %v828_v35 }
 0xd58   :  { %v569_v23 = vpop.permute.xlu2 %568 }
 0xd59   :  { %v571_v25 = vmul.f32 %v569_v23, %v560_v24 }
 0xd5b   :  { %573 = vrot.lane.b32.xlu1 %v571_v25, %s1740_s13 }
 0xd60   :  { %v838_v46 = vpop.permute.xlu2 %837 }
 0xd61   :  { %v840_v47 = vmul.f32 %v838_v46, %v833_v37 }
 0xd7a   :  { %v843_v38 = vpop.permute.xlu0 %842 }
 0xd7b   :  { %v845_v39 = vmul.f32 %v843_v38, %v833_v37 }
 0xd7d   :  { %847 = vrot.lane.b32.xlu0 %v845_v39, %s1740_s13 }
 0xdcd   :  { %v574_v42 = vpop.permute.xlu1 %573 }
 0xdce   :  { %v2040_v43 = vadd.f32 %v574_v42, %v566_v41 }
 0xdd0   :  { %1577 = vtanh.f32 %v2040_v43  ;;  %v638_v38 = vrot.slane %v2040_v43, 6 }
 0xdd6   :  { %v1578_v45 = vpop.eup %1577 }
 0xdd7   :  { %579 = vrot.lane.b32.xlu1 %v1578_v45, %s1741_s16 }
 0xdef   :  { %v848_v48 = vpop.permute.xlu0 %847 }
 0xdf0   :  { %v2044_v17 = vadd.f32 %v848_v48, %v840_v47 }
 0xdf2   :  { %1579 = vtanh.f32 %v2044_v17  ;;  %v909_v42 = vrot.slane %v2044_v17, 6 }
 0xdf8   :  { %v1580_v49 = vpop.eup %1579 }
 0xdf9   :  { %853 = vrot.lane.b32.xlu2 %v1580_v49, %s1741_s16 }
 0xe49   :  { %v580_v44 = vpop.permute.xlu1 %579 }
 0xe4a   :  { %v2048_v53 = vmul.f32 %v580_v44, %v560_v24 }
 0xe4c   :  { %v588_v55 = vrot.slane %v2048_v53, 2 }
 0xe4e   :  { %589 = vrot.lane.b32.xlu0 %v588_v55, %s1740_s13 }
 0xe53   :  { %v854_v56 = vpop.permute.xlu2 %853 }
 0xe54   :  { %v856_v57 = vmul.f32 %v854_v56, %v833_v37 }
 0xe56   :  { %858 = vrot.lane.b32.xlu1 %v856_v57, %s1740_s13 }
 0xec0   :  { %v590_v58 = vpop.permute.xlu0 %589 }
 0xec1   :  { %1478 = vmatmul.msk.f32.vlgmr.msra.gmra.mxu3 %vm123_vm0, %v590_v58 }
 0xec2   :  { %1098 = vmatpush.msra.mxu3 %v1969_v50 }
 0xec4   :  { %1099 = vmatpush.msra.mxu3 %v1971_v51 }
 0xec6   :  { %1100 = vmatpush.msra.mxu3 %v1982_v52 }
 0xec8   :  { %v859_v59 = vpop.permute.xlu1 %858  ;;  %1101 = vmatpush.msra.mxu3 %v1988_v54 }
 0xec9   :  { %861 = vst.msk [vmem:[#allocation2] sm:$0x3] %vm222_vm7, %v859_v59  ;;  %1493 = vmatmul.msk.f32.vlgmr.msrb.gmra.mxu3 %vm123_vm0, %v859_v59 }
 0xf44   :  { %v610_v60 = vpop.f32.mrf.mxu3 }
 0xf45   :  { %v614_v61 = vrot.slane %v610_v60, 4 }
 0xf47   :  { %v616_v62 = vadd.f32 %v614_v61, %v1952_v19 }
 0xf49   :  { %1581 = vtanh.f32 %v616_v62  ;;  %v1479_v5 = vmul.f32 -1.442695, %v616_v62 }
 0xf4c   :  { %v881_v63 = vpop.f32.mrf.mxu3 }
 0xf4d   :  { %v885_v30 = vrot.slane %v881_v63, 6 }
 0xf4f   :  { %v1582_v1 = vpop.eup %1581  ;;  %v887_v2 = vadd.f32 %v885_v30, %v2028_v3 }
 0xf50   :  { %642 = vrot.lane.b32.xlu2 %v1582_v1, %s1741_s16 }
 0xf51   :  { %1583 = vtanh.f32 %v887_v2  ;;  %v1494_v11 = vmul.f32 -1.442695, %v887_v2 }
 0xf52   :  { %1585 = vpow2.f32 %v1479_v5 }
 0xf57   :  { %v1584_v4 = vpop.eup %1583 }
 0xf58   :  { %913 = vrot.lane.b32.xlu0 %v1584_v4, %s1741_s16  ;;  %v1586_v6 = vpop.eup %1585 }
 0xf59   :  { %v620_v7 = vadd.f32 1.0, %v1586_v6 }
 0xf5b   :  { %1587 = vrcp.f32 %v620_v7  ;;  %v632_v14 = vand.u32 2147483648, %v620_v7  ;;  %vm626_vm9 = vweird.f32 %v620_v7  ;;  %v630_v15 = vand.u32 2147483647, %v620_v7 }
 0xf5c   :  { %1589 = vpow2.f32 %v1494_v11 }
 0xf5d   :  { %v633_v20 = vor.u32 1.1754944e-38, %v632_v14  ;;  %vm631_vm14 = vcmp.eq.f32.partialorder %v630_v15, 8.507059e+37 }
 0xf61   :  { %v1588_v8 = vpop.eup %1587 }
 0xf62   :  { %v622_v9 = vmul.f32 %v1588_v8, %v620_v7  ;;  %vm627_vm8 = vweird.f32 %v1588_v8  ;;  %v1590_v16 = vpop.eup %1589 }
 0xf63   :  { %vm628_vm10 = vmor %vm626_vm9, %vm627_vm8  ;;  %v891_v22 = vadd.f32 1.0, %v1590_v16 }
 0xf64   :  { %v623_v10 = vsub.f32 1.0, %v622_v9 }
 0xf65   :  { %1591 = vrcp.f32 %v891_v22  ;;  %v903_v32 = vand.u32 2147483648, %v891_v22  ;;  %vm897_vm2 = vweird.f32 %v891_v22  ;;  %v901_v33 = vand.u32 2147483647, %v891_v22 }
 0xf66   :  { %v624_v12 = vmul.f32 %v1588_v8, %v623_v10 }
 0xf67   :  { %v904_v27 = vor.u32 1.1754944e-38, %v903_v32  ;;  %vm902_vm4 = vcmp.eq.f32.partialorder %v901_v33, 8.507059e+37 }
 0xf68   :  { %v625_v13 = vadd.f32 %v1588_v8, %v624_v12 }
 0xf6a   :  { %v629_v18 = vsel %vm628_vm10, %v1588_v8, %v625_v13 }
 0xf6b   :  { %v634_v21 = vsel %vm631_vm14, %v633_v20, %v629_v18  ;;  %v1592_v25 = vpop.eup %1591 }
 0xf6c   :  { %v893_v26 = vmul.f32 %v1592_v25, %v891_v22  ;;  %vm898_vm15 = vweird.f32 %v1592_v25  ;;  %v640_v39 = vmul.f32 %v638_v38, %v634_v21 }
 0xf6d   :  { %vm899_vm3 = vmor %vm897_vm2, %vm898_vm15 }
 0xf6e   :  { %v894_v28 = vsub.f32 1.0, %v893_v26 }
 0xf70   :  { %v895_v29 = vmul.f32 %v1592_v25, %v894_v28 }
 0xf72   :  { %v896_v31 = vadd.f32 %v1592_v25, %v895_v29 }
 0xf74   :  { %v900_v34 = vsel %vm899_vm3, %v1592_v25, %v896_v31 }
 0xf75   :  { %v905_v36 = vsel %vm902_vm4, %v904_v27, %v900_v34 }
 0xf76   :  { %v911_v45 = vmul.f32 %v909_v42, %v905_v36 }
 0xfaa   :  { %v643_v23 = vpop.permute.xlu2 %642 }
 0xfab   :  { %v645_v24 = vmul.f32 %v643_v23, %v634_v21 }
 0xfad   :  { %647 = vrot.lane.b32.xlu1 %v645_v24, %s1740_s13 }
 0xfca   :  { %v914_v35 = vpop.permute.xlu0 %913 }
 0xfcb   :  { %v916_v37 = vmul.f32 %v914_v35, %v905_v36 }
 0xfcd   :  { %918 = vrot.lane.b32.xlu2 %v916_v37, %s1740_s13 }
0x101f   :  { %v648_v40 = vpop.permute.xlu1 %647 }
0x1020   :  { %v2067_v41 = vadd.f32 %v648_v40, %v640_v39 }
0x1022   :  { %1593 = vtanh.f32 %v2067_v41 }
0x1027   :  { %v919_v46 = vpop.permute.xlu2 %918 }
0x1028   :  { %v1594_v47 = vpop.eup %1593  ;;  %v921_v48 = vadd.f32 %v919_v46, %v911_v45 }
0x1029   :  { %653 = vrot.lane.b32.xlu0 %v1594_v47, %s1741_s16 }
0x102a   :  { %1595 = vtanh.f32 %v921_v48  ;;  %v983_v16 = vrot.slane %v921_v48, 6  ;;  %v712_v48 = vrot.slane %v2067_v41, 6 }
0x1030   :  { %v1596_v49 = vpop.eup %1595 }
0x1031   :  { %924 = vrot.lane.b32.xlu1 %v1596_v49, %s1741_s16 }
0x109b   :  { %v654_v44 = vpop.permute.xlu0 %653 }
0x109c   :  { %v2073_v43 = vmul.f32 %v654_v44, %v634_v21 }
0x109e   :  { %v662_v55 = vrot.slane %v2073_v43, 4 }
0x10a0   :  { %663 = vrot.lane.b32.xlu2 %v662_v55, %s1740_s13 }
0x10a3   :  { %v925_v56 = vpop.permute.xlu1 %924 }
0x10a4   :  { %v2077_v57 = vmul.f32 %v925_v56, %v905_v36 }
0x10a6   :  { %v933_v17 = vrot.slane %v2077_v57, 2 }
0x10a8   :  { %934 = vrot.lane.b32.xlu0 %v933_v17, %s1740_s13 }
0x10fa   :  { %v664_v58 = vpop.permute.xlu2 %663 }
0x10fb   :  { %1480 = vmatmul.msk.f32.vlgmr.msrb.gmra.mxu0 %vm123_vm0, %v664_v58 }
0x10fc   :  { %1166 = vmatpush.msrb.mxu0 %v1969_v50 }
0x10fe   :  { %1167 = vmatpush.msrb.mxu0 %v1971_v51 }
0x1100   :  { %1168 = vmatpush.msrb.mxu0 %v1982_v52 }
0x1102   :  { %1169 = vmatpush.msrb.mxu0 %v1988_v54 }
0x111a   :  { %v935_v59 = vpop.permute.xlu0 %934 }
0x111b   :  { %1495 = vmatmul.msk.f32.vlgmr.msra.gmra.mxu0 %vm123_vm0, %v935_v59 }
0x1178   :  { %v684_v60 = vpop.f32.mrf.mxu0 }
0x1179   :  { %v688_v8 = vrot.slane %v684_v60, 2 }
0x117b   :  { %v690_v11 = vadd.f32 %v688_v8, %v1952_v19 }
0x117d   :  { %v1481_v19 = vmul.f32 -1.442695, %v690_v11 }
0x1198   :  { %v955_v61 = vpop.f32.mrf.mxu0 }
0x1199   :  { %v959_v62 = vrot.slane %v955_v61, 4 }
0x119b   :  { %v961_v63 = vadd.f32 %v959_v62, %v2028_v3 }
0x119d   :  { %1597 = vtanh.f32 %v961_v63  ;;  %v1496_v1 = vmul.f32 -1.442695, %v961_v63 }
0x119f   :  { %1599 = vpow2.f32 %v1496_v1 }
0x11a3   :  { %v1598_v30 = vpop.eup %1597 }
0x11a4   :  { %987 = vrot.lane.b32.xlu1 %v1598_v30, %s1741_s16 }
0x11a5   :  { %v1600_v50 = vpop.eup %1599 }
0x11a6   :  { %v965_v51 = vadd.f32 1.0, %v1600_v50 }
0x11a8   :  { %1601 = vrcp.f32 %v965_v51  ;;  %v977_v6 = vand.u32 2147483648, %v965_v51  ;;  %vm971_vm6 = vweird.f32 %v965_v51  ;;  %v975_v7 = vand.u32 2147483647, %v965_v51 }
0x11a9   :  { %1603 = vtanh.f32 %v690_v11 }
0x11aa   :  { %v978_v10 = vor.u32 1.1754944e-38, %v977_v6  ;;  %vm976_vm8 = vcmp.eq.f32.partialorder %v975_v7, 8.507059e+37 }
0x11ae   :  { %v1602_v52 = vpop.eup %1601 }
0x11af   :  { %v967_v2 = vmul.f32 %v1602_v52, %v965_v51  ;;  %vm972_vm5 = vweird.f32 %v1602_v52  ;;  %v1604_v15 = vpop.eup %1603 }
0x11b0   :  { %vm973_vm1 = vmor %vm971_vm6, %vm972_vm5 }
0x11b1   :  { %v968_v54 = vsub.f32 1.0, %v967_v2 }
0x11b3   :  { %v969_v4 = vmul.f32 %v1602_v52, %v968_v54 }
0x11b5   :  { %v970_v5 = vadd.f32 %v1602_v52, %v969_v4 }
0x11b7   :  { %v974_v9 = vsel %vm973_vm1, %v1602_v52, %v970_v5 }
0x11b8   :  { %v979_v13 = vsel %vm976_vm8, %v978_v10, %v974_v9 }
0x11b9   :  { %v985_v18 = vmul.f32 %v983_v16, %v979_v13 }
0x1216   :  { %v988_v12 = vpop.permute.xlu1 %987 }
0x1217   :  { %v990_v14 = vmul.f32 %v988_v12, %v979_v13 }
0x1219   :  { %992 = vrot.lane.b32.xlu2 %v990_v14, %s1740_s13 }
0x1221   :  { %716 = vrot.lane.b32.xlu2 %v1604_v15, %s1741_s16 }
0x1273   :  { %v993_v20 = vpop.permute.xlu2 %992 }
0x1274   :  { %v2092_v22 = vadd.f32 %v993_v20, %v985_v18 }
0x1276   :  { %1605 = vtanh.f32 %v2092_v22  ;;  %v1057_v5 = vrot.slane %v2092_v22, 6 }
0x1277   :  { %1607 = vpow2.f32 %v1481_v19 }
0x127b   :  { %v717_v37 = vpop.permute.xlu2 %716 }
0x127c   :  { %v1606_v21 = vpop.eup %1605 }
0x127d   :  { %998 = vrot.lane.b32.xlu0 %v1606_v21, %s1741_s16  ;;  %v1608_v23 = vpop.eup %1607 }
0x127e   :  { %v694_v24 = vadd.f32 1.0, %v1608_v23 }
0x1280   :  { %1609 = vrcp.f32 %v694_v24  ;;  %v706_v27 = vand.u32 2147483648, %v694_v24  ;;  %vm700_vm10 = vweird.f32 %v694_v24  ;;  %v704_v35 = vand.u32 2147483647, %v694_v24 }
0x1282   :  { %v707_v38 = vor.u32 1.1754944e-38, %v706_v27  ;;  %vm705_vm15 = vcmp.eq.f32.partialorder %v704_v35, 8.507059e+37 }
0x1286   :  { %v1610_v25 = vpop.eup %1609 }
0x1287   :  { %v696_v26 = vmul.f32 %v1610_v25, %v694_v24  ;;  %vm701_vm9 = vweird.f32 %v1610_v25 }
0x1288   :  { %vm702_vm14 = vmor %vm700_vm10, %vm701_vm9 }
0x1289   :  { %v697_v28 = vsub.f32 1.0, %v696_v26 }
0x128b   :  { %v698_v29 = vmul.f32 %v1610_v25, %v697_v28 }
0x128d   :  { %v699_v33 = vadd.f32 %v1610_v25, %v698_v29 }
0x128f   :  { %v703_v36 = vsel %vm702_vm14, %v1610_v25, %v699_v33 }
0x1290   :  { %v708_v39 = vsel %vm705_vm15, %v707_v38, %v703_v36 }
0x1291   :  { %v719_v40 = vmul.f32 %v717_v37, %v708_v39  ;;  %v714_v44 = vmul.f32 %v712_v48, %v708_v39 }
0x12ef   :  { %v999_v31 = vpop.permute.xlu0 %998 }
0x12f0   :  { %v2096_v32 = vmul.f32 %v999_v31, %v979_v13 }
0x12f2   :  { %v1007_v34 = vrot.slane %v2096_v32, 4 }
0x12f4   :  { %1008 = vrot.lane.b32.xlu1 %v1007_v34, %s1740_s13 }
0x12fc   :  { %721 = vrot.lane.b32.xlu1 %v719_v40, %s1740_s13 }
0x1366   :  { %v1009_v42 = vpop.permute.xlu1 %1008 }
0x1367   :  { %1497 = vmatmul.msk.f32.vlgmr.msra.gmra.mxu2 %vm123_vm0, %v1009_v42 }
0x136e   :  { %v722_v49 = vpop.permute.xlu1 %721 }
0x136f   :  { %v2104_v55 = vadd.f32 %v722_v49, %v714_v44 }
0x13ea   :  { %v1029_v45 = vpop.f32.mrf.mxu2 }
0x13eb   :  { %v1033_v46 = vrot.slane %v1029_v45, 2 }
0x13ed   :  { %v1035_v47 = vadd.f32 %v1033_v46, %v2028_v3 }
0x13ef   :  { %1611 = vtanh.f32 %v1035_v47  ;;  %v1498_v58 = vmul.f32 -1.442695, %v1035_v47 }
0x13f0   :  { %1613 = vtanh.f32 %v2104_v55 }
0x13f1   :  { %1615 = vpow2.f32 %v1498_v58 }
0x13f5   :  { %v1612_v56 = vpop.eup %1611 }
0x13f6   :  { %1061 = vrot.lane.b32.xlu0 %v1612_v56, %s1741_s16  ;;  %v1614_v17 = vpop.eup %1613 }
0x13f7   :  { %v1616_v3 = vpop.eup %1615 }
0x13f8   :  { %v1039_v41 = vadd.f32 1.0, %v1616_v3 }
0x13fa   :  { %1617 = vrcp.f32 %v1039_v41  ;;  %v1051_v30 = vand.u32 2147483648, %v1039_v41  ;;  %vm1045_vm3 = vweird.f32 %v1039_v41  ;;  %v1049_v1 = vand.u32 2147483647, %v1039_v41 }
0x13fc   :  { %v1052_v51 = vor.u32 1.1754944e-38, %v1051_v30  ;;  %vm1050_vm5 = vcmp.eq.f32.partialorder %v1049_v1, 8.507059e+37 }
0x13fe   :  { %727 = vrot.lane.b32.xlu0 %v1614_v17, %s1741_s16 }
0x1400   :  { %v1618_v59 = vpop.eup %1617 }
0x1401   :  { %v1041_v60 = vmul.f32 %v1618_v59, %v1039_v41  ;;  %vm1046_vm2 = vweird.f32 %v1618_v59 }
0x1402   :  { %vm1047_vm4 = vmor %vm1045_vm3, %vm1046_vm2 }
0x1403   :  { %v1042_v61 = vsub.f32 1.0, %v1041_v60 }
0x1405   :  { %v1043_v62 = vmul.f32 %v1618_v59, %v1042_v61 }
0x1406   :  { %658 = vrot.lane.b32.xlu0 %v2073_v43, %s1740_s13 }
0x1407   :  { %v1044_v63 = vadd.f32 %v1618_v59, %v1043_v62 }
0x1409   :  { %v1048_v50 = vsel %vm1047_vm4, %v1618_v59, %v1044_v63 }
0x140a   :  { %v1053_v43 = vsel %vm1050_vm5, %v1052_v51, %v1048_v50 }
0x140b   :  { %v1059_v6 = vmul.f32 %v1057_v5, %v1053_v43 }
0x1468   :  { %v1062_v52 = vpop.permute.xlu0 %1061 }
0x1469   :  { %v1064_v2 = vmul.f32 %v1062_v52, %v1053_v43 }
0x146b   :  { %1066 = vrot.lane.b32.xlu2 %v1064_v2, %s1740_s13 }
0x1470   :  { %v728_v54 = vpop.permute.xlu0 %727 }
0x1471   :  { %v730_v11 = vmul.f32 %v728_v54, %v708_v39 }
0x1473   :  { %584 = vrot.lane.b32.xlu2 %v2048_v53, %s1740_s13 }
0x1478   :  { %v659_v4 = vpop.permute.xlu0 %658 }
0x1479   :  { %661 = vst.msk [vmem:[#allocation2 + $0x8] sm:$0x30] %vm369_vm12, %v659_v4 }
0x14c5   :  { %v1067_v7 = vpop.permute.xlu2 %1066 }
0x14c6   :  { %v1069_v8 = vadd.f32 %v1067_v7, %v1059_v6 }
0x14c8   :  { %1619 = vtanh.f32 %v1069_v8  ;;  %v1128_v39 = vrot.slane %v1069_v8, 6 }
0x14cd   :  { %v585_v9 = vpop.permute.xlu2 %584 }
0x14ce   :  { %v1620_v10 = vpop.eup %1619  ;;  %587 = vst.msk [vmem:[#allocation2 + $0x8] sm:$0xc] %vm294_vm11, %v585_v9 }
0x14cf   :  { %1072 = vrot.lane.b32.xlu1 %v1620_v10, %s1741_s16 }
0x14d7   :  { %732 = vrot.lane.b32.xlu1 %v730_v11, %s1740_s13 }
0x1541   :  { %v1073_v12 = vpop.permute.xlu1 %1072 }
0x1542   :  { %v2119_v53 = vmul.f32 %v1073_v12, %v1053_v43 }
0x1544   :  { %v1081_v13 = vrot.slane %v2119_v53, 6 }
0x1546   :  { %1082 = vrot.lane.b32.xlu2 %v1081_v13, %s1740_s13 }
0x1549   :  { %v733_v14 = vpop.permute.xlu1 %732 }
0x154a   :  { %735 = vst.msk [vmem:[#allocation2 + $0x8] sm:$0xc0] %vm444_vm13, %v733_v14 }
0x154b   :  { %736 = vst.msk [vmem:[#allocation7 - $0x6] sm:$0xc0] %vm444_vm13, %v733_v14 }
0x1551   :  { %v743_v15 = vld [vmem:[#allocation2 + $0x8] sm:$0xff] }
0x1552   :  { %1490 = vmatmul.msk.f32.gmra.mxu1 %vm123_vm0, %v743_v15 }
0x15a0   :  { %v1083_v16 = vpop.permute.xlu2 %1082 }
0x15a1   :  { %1499 = vmatmul.msk.f32.vlgmr.msra.gmra.mxu3 %vm123_vm0, %v1083_v16 }
0x15cf   :  { %v789_v18 = vpop.f32.mrf.mxu1 }
0x15d0   :  { %v2128_v20 = vadd.f32 %v2025_v0, %v789_v18 }
0x1624   :  { %v1103_v22 = vpop.f32.mrf.mxu3 }
0x1625   :  { %v1106_v21 = vadd.f32 %v1103_v22, %v2128_v20 }
0x1627   :  { %1621 = vtanh.f32 %v1106_v21  ;;  %v1500_v23 = vmul.f32 -1.442695, %v1106_v21 }
0x1629   :  { %1623 = vpow2.f32 %v1500_v23 }
0x162d   :  { %v1622_v19 = vpop.eup %1621 }
0x162e   :  { %1132 = vrot.lane.b32.xlu0 %v1622_v19, %s1741_s16 }
0x162f   :  { %v1624_v24 = vpop.eup %1623 }
0x1630   :  { %v1110_v25 = vadd.f32 1.0, %v1624_v24 }
0x1632   :  { %1625 = vrcp.f32 %v1110_v25  ;;  %v1122_v0 = vand.u32 2147483648, %v1110_v25  ;;  %vm1116_vm1 = vweird.f32 %v1110_v25  ;;  %v1120_v34 = vand.u32 2147483647, %v1110_v25 }
0x1634   :  { %v1123_v35 = vor.u32 1.1754944e-38, %v1122_v0  ;;  %vm1121_vm9 = vcmp.eq.f32.partialorder %v1120_v34, 8.507059e+37 }
0x1638   :  { %v1626_v26 = vpop.eup %1625 }
0x1639   :  { %v1112_v28 = vmul.f32 %v1626_v26, %v1110_v25  ;;  %vm1117_vm6 = vweird.f32 %v1626_v26 }
0x163a   :  { %vm1118_vm8 = vmor %vm1116_vm1, %vm1117_vm6 }
0x163b   :  { %v1113_v29 = vsub.f32 1.0, %v1112_v28 }
0x163d   :  { %v1114_v31 = vmul.f32 %v1626_v26, %v1113_v29 }
0x163f   :  { %v1115_v33 = vadd.f32 %v1626_v26, %v1114_v31 }
0x1641   :  { %v1119_v27 = vsel %vm1118_vm8, %v1626_v26, %v1115_v33 }
0x1642   :  { %v1124_v37 = vsel %vm1121_vm9, %v1123_v35, %v1119_v27  ;;  %vm1417_vm9 = vcmask 7174  }
0x1643   :  { %v1130_v40 = vmul.f32 %v1128_v39, %v1124_v37 }
0x16a0   :  { %v1133_v36 = vpop.permute.xlu0 %1132 }
0x16a1   :  { %v1135_v38 = vmul.f32 %v1133_v36, %v1124_v37 }
0x16a3   :  { %1137 = vrot.lane.b32.xlu1 %v1135_v38, %s1740_s13 }
0x1715   :  { %v1138_v42 = vpop.permute.xlu1 %1137 }
0x1716   :  { %v1140_v45 = vadd.f32 %v1138_v42, %v1130_v40 }
0x1718   :  { %1627 = vtanh.f32 %v1140_v45  ;;  %v1199_v4 = vrot.slane %v1140_v45, 6 }
0x171e   :  { %v1628_v46 = vpop.eup %1627 }
0x171f   :  { %1143 = vrot.lane.b32.xlu2 %v1628_v46, %s1741_s16 }
0x1779   :  { %v1144_v47 = vpop.permute.xlu2 %1143 }
0x177a   :  { %v1146_v48 = vmul.f32 %v1144_v47, %v1124_v37 }
0x177c   :  { %1148 = vrot.lane.b32.xlu0 %v1146_v48, %s1740_s13 }
0x17ee   :  { %v1149_v49 = vpop.permute.xlu0 %1148 }
0x17ef   :  { %1151 = vst.msk [vmem:[#allocation2 + $0x8] sm:$0x3] %vm222_vm7, %v1149_v49  ;;  %1501 = vmatmul.msk.f32.vlgmr.msrb.gmra.mxu0 %vm123_vm0, %v1149_v49 }
0x186c   :  { %v1171_v44 = vpop.f32.mrf.mxu0 }
0x186d   :  { %v1175_v56 = vrot.slane %v1171_v44, 6 }
0x186f   :  { %v1177_v17 = vadd.f32 %v1175_v56, %v2128_v20  ;;  %v1523_v56 = vld [vmem:[%s2208_s7] ss:$0 sm:$0xff]  ;;  %s1743_s7 = smov [#allocation7]  }
0x1870   :  { %s1425_s5 = sshll.u32 %s1743_s7, 4  ;;  %s1426_s5 = int_to_ptr.vmem [resolvable:$true] %s1425_s5 }
0x1871   :  { %1629 = vtanh.f32 %v1177_v17  ;;  %v1502_v3 = vmul.f32 -1.442695, %v1177_v17 }
0x1873   :  { %1631 = vpow2.f32 %v1502_v3 }
0x1877   :  { %v1630_v58 = vpop.eup %1629 }
0x1878   :  { %1203 = vrot.lane.b32.xlu1 %v1630_v58, %s1741_s16 }
0x1879   :  { %v1632_v41 = vpop.eup %1631 }
0x187a   :  { %v1181_v59 = vadd.f32 1.0, %v1632_v41 }
0x187c   :  { %1633 = vrcp.f32 %v1181_v59  ;;  %v1193_v1 = vand.u32 2147483648, %v1181_v59  ;;  %vm1187_vm10 = vweird.f32 %v1181_v59  ;;  %v1191_v50 = vand.u32 2147483647, %v1181_v59 }
0x187e   :  { %v1194_v52 = vor.u32 1.1754944e-38, %v1193_v1  ;;  %vm1192_vm15 = vcmp.eq.f32.partialorder %v1191_v50, 8.507059e+37 }
0x1882   :  { %v1634_v60 = vpop.eup %1633 }
0x1883   :  { %v1183_v61 = vmul.f32 %v1634_v60, %v1181_v59  ;;  %vm1188_vm7 = vweird.f32 %v1634_v60 }
0x1884   :  { %vm1189_vm14 = vmor %vm1187_vm10, %vm1188_vm7 }
0x1885   :  { %v1184_v62 = vsub.f32 1.0, %v1183_v61 }
0x1887   :  { %v1185_v63 = vmul.f32 %v1634_v60, %v1184_v62 }
0x1889   :  { %v1186_v30 = vadd.f32 %v1634_v60, %v1185_v63 }
0x188b   :  { %v1190_v51 = vsel %vm1189_vm14, %v1634_v60, %v1186_v30 }
0x188c   :  { %v1195_v2 = vsel %vm1192_vm15, %v1194_v52, %v1190_v51 }
0x188d   :  { %v1201_v5 = vmul.f32 %v1199_v4, %v1195_v2 }
0x18ea   :  { %v1204_v43 = vpop.permute.xlu1 %1203 }
0x18eb   :  { %v1206_v54 = vmul.f32 %v1204_v43, %v1195_v2 }
0x18ed   :  { %1208 = vrot.lane.b32.xlu2 %v1206_v54, %s1740_s13 }
0x1947   :  { %v1209_v6 = vpop.permute.xlu2 %1208 }
0x1948   :  { %v1211_v7 = vadd.f32 %v1209_v6, %v1201_v5 }
0x194a   :  { %1635 = vtanh.f32 %v1211_v7  ;;  %v1273_v35 = vrot.slane %v1211_v7, 6 }
0x1950   :  { %v1636_v8 = vpop.eup %1635 }
0x1951   :  { %1214 = vrot.lane.b32.xlu0 %v1636_v8, %s1741_s16 }
0x19c3   :  { %v1215_v9 = vpop.permute.xlu0 %1214 }
0x19c4   :  { %v2141_v10 = vmul.f32 %v1215_v9, %v1195_v2 }
0x19c6   :  { %v1223_v11 = vrot.slane %v2141_v10, 2 }
0x19c8   :  { %1224 = vrot.lane.b32.xlu1 %v1223_v11, %s1740_s13 }
0x1a3a   :  { %v1225_v12 = vpop.permute.xlu1 %1224 }
0x1a3b   :  { %1503 = vmatmul.msk.f32.vlgmr.msrb.gmra.mxu1 %vm123_vm0, %v1225_v12 }
0x1ab8   :  { %v1245_v13 = vpop.f32.mrf.mxu1 }
0x1ab9   :  { %v1249_v14 = vrot.slane %v1245_v13, 4 }
0x1abb   :  { %v1251_v15 = vadd.f32 %v1249_v14, %v2128_v20 }
0x1abd   :  { %1637 = vtanh.f32 %v1251_v15  ;;  %v1504_v18 = vmul.f32 -1.442695, %v1251_v15 }
0x1abf   :  { %1639 = vpow2.f32 %v1504_v18 }
0x1ac3   :  { %v1638_v16 = vpop.eup %1637 }
0x1ac4   :  { %1277 = vrot.lane.b32.xlu2 %v1638_v16, %s1741_s16  ;;  %v1524_v16 = vld [vmem:[#allocation3] ss:$0 sm:$0xff] }
0x1ac5   :  { %v1640_v22 = vpop.eup %1639 }
0x1ac6   :  { %v1255_v21 = vadd.f32 1.0, %v1640_v22 }
0x1ac8   :  { %1641 = vrcp.f32 %v1255_v21  ;;  %v1267_v28 = vand.u32 2147483648, %v1255_v21  ;;  %vm1261_vm3 = vweird.f32 %v1255_v21  ;;  %v1265_v29 = vand.u32 2147483647, %v1255_v21 }
0x1aca   :  { %v1268_v33 = vor.u32 1.1754944e-38, %v1267_v28  ;;  %vm1266_vm5 = vcmp.eq.f32.partialorder %v1265_v29, 8.507059e+37 }
0x1ace   :  { %v1642_v19 = vpop.eup %1641 }
0x1acf   :  { %v1257_v23 = vmul.f32 %v1642_v19, %v1255_v21  ;;  %vm1262_vm2 = vweird.f32 %v1642_v19 }
0x1ad0   :  { %vm1263_vm4 = vmor %vm1261_vm3, %vm1262_vm2 }
0x1ad1   :  { %v1258_v24 = vsub.f32 1.0, %v1257_v23 }
0x1ad3   :  { %v1259_v25 = vmul.f32 %v1642_v19, %v1258_v24 }
0x1ad5   :  { %v1260_v26 = vadd.f32 %v1642_v19, %v1259_v25 }
0x1ad7   :  { %v1264_v31 = vsel %vm1263_vm4, %v1642_v19, %v1260_v26 }
0x1ad8   :  { %v1269_v34 = vsel %vm1266_vm5, %v1268_v33, %v1264_v31 }
0x1ad9   :  { %v1275_v36 = vmul.f32 %v1273_v35, %v1269_v34 }
0x1b1e   :  { %v1278_v0 = vpop.permute.xlu2 %1277 }
0x1b1f   :  { %v1280_v27 = vmul.f32 %v1278_v0, %v1269_v34 }
0x1b21   :  { %1282 = vrot.lane.b32.xlu0 %v1280_v27, %s1740_s13 }
0x1b93   :  { %v1283_v37 = vpop.permute.xlu0 %1282 }
0x1b94   :  { %v1285_v38 = vadd.f32 %v1283_v37, %v1275_v36 }
0x1b96   :  { %1643 = vtanh.f32 %v1285_v38  ;;  %v1347_v2 = vrot.slane %v1285_v38, 6 }
0x1b9c   :  { %v1644_v39 = vpop.eup %1643 }
0x1b9d   :  { %1288 = vrot.lane.b32.xlu1 %v1644_v39, %s1741_s16 }
0x1c0f   :  { %v1289_v40 = vpop.permute.xlu1 %1288 }
0x1c10   :  { %v2150_v42 = vmul.f32 %v1289_v40, %v1269_v34 }
0x1c12   :  { %v1297_v45 = vrot.slane %v2150_v42, 4 }
0x1c14   :  { %1298 = vrot.lane.b32.xlu2 %v1297_v45, %s1740_s13 }
0x1c6e   :  { %v1299_v46 = vpop.permute.xlu2 %1298 }
0x1c6f   :  { %1505 = vmatmul.msk.f32.vlgmr.msrb.gmra.mxu2 %vm123_vm0, %v1299_v46 }
0x1cf2   :  { %v1319_v47 = vpop.f32.mrf.mxu2 }
0x1cf3   :  { %v1323_v48 = vrot.slane %v1319_v47, 2 }
0x1cf5   :  { %v1325_v49 = vadd.f32 %v1323_v48, %v2128_v20 }
0x1cf7   :  { %1645 = vtanh.f32 %v1325_v49  ;;  %v1506_v17 = vmul.f32 -1.442695, %v1325_v49 }
0x1cf9   :  { %1647 = vpow2.f32 %v1506_v17 }
0x1cfd   :  { %v1646_v44 = vpop.eup %1645 }
0x1cfe   :  { %1351 = vrot.lane.b32.xlu0 %v1646_v44, %s1741_s16 }
0x1cff   :  { %v1648_v58 = vpop.eup %1647 }
0x1d00   :  { %v1329_v3 = vadd.f32 1.0, %v1648_v58 }
0x1d02   :  { %1649 = vrcp.f32 %v1329_v3  ;;  %v1341_v62 = vand.u32 2147483648, %v1329_v3  ;;  %vm1335_vm6 = vweird.f32 %v1329_v3  ;;  %v1339_v63 = vand.u32 2147483647, %v1329_v3 }
0x1d04   :  { %v1342_v1 = vor.u32 1.1754944e-38, %v1341_v62  ;;  %vm1340_vm8 = vcmp.eq.f32.partialorder %v1339_v63, 8.507059e+37 }
0x1d06   :  { %1382 = vrot.lane.b32.xlu0 %v1523_v56, %s1742_s28 }
0x1d08   :  { %v1650_v20 = vpop.eup %1649 }
0x1d09   :  { %v1331_v41 = vmul.f32 %v1650_v20, %v1329_v3  ;;  %vm1336_vm0 = vweird.f32 %v1650_v20 }
0x1d0a   :  { %vm1337_vm1 = vmor %vm1335_vm6, %vm1336_vm0 }
0x1d0b   :  { %v1332_v59 = vsub.f32 1.0, %v1331_v41 }
0x1d0d   :  { %v1333_v60 = vmul.f32 %v1650_v20, %v1332_v59 }
0x1d0e   :  { %738 = vrot.lane.b32.xlu0 %v2104_v55, %s1742_s28 }
0x1d0f   :  { %v1334_v61 = vadd.f32 %v1650_v20, %v1333_v60 }
0x1d11   :  { %v1338_v30 = vsel %vm1337_vm1, %v1650_v20, %v1334_v61 }
0x1d12   :  { %v1343_v55 = vsel %vm1340_vm8, %v1342_v1, %v1338_v30 }
0x1d13   :  { %v1349_v54 = vmul.f32 %v1347_v2, %v1343_v55 }
0x1d70   :  { %v1352_v50 = vpop.permute.xlu0 %1351 }
0x1d71   :  { %v1354_v51 = vmul.f32 %v1352_v50, %v1343_v55 }
0x1d73   :  { %1356 = vrot.lane.b32.xlu1 %v1354_v51, %s1740_s13 }
0x1d78   :  { %v1383_v52 = vpop.permute.xlu0 %1382 }
0x1d80   :  { %v739_v43 = vpop.permute.xlu0 %738 }
0x1d81   :  { %741 = vst.msk [vmem:[#allocation8 - $0x6] sm:$0xc0] %vm444_vm13, %v739_v43 }
0x1de5   :  { %v1357_v4 = vpop.permute.xlu1 %1356 }
0x1de6   :  { %v1359_v5 = vadd.f32 %v1357_v4, %v1349_v54 }
0x1de8   :  { %1651 = vtanh.f32 %v1359_v5  ;;  %1374 = vrot.lane.b32.xlu0 %v1359_v5, %s1742_s28 }
0x1dee   :  { %v1652_v6 = vpop.eup %1651 }
0x1def   :  { %1362 = vrot.lane.b32.xlu2 %v1652_v6, %s1741_s16  ;;  %s1745_s16 = smov 2  }
0x1df0   :  { %1003 = vrot.lane.b32.xlu0 %v2096_v32, %s1740_s13 }
0x1df8   :  { %1219 = vrot.lane.b32.xlu0 %v2141_v10, %s1740_s13 }
0x1e49   :  { %v1363_v7 = vpop.permute.xlu2 %1362 }
0x1e4a   :  { %v1365_v8 = vmul.f32 %v1363_v7, %v1343_v55 }
0x1e4c   :  { %v1385_v9 = vmul.f32 %v1383_v52, %v1365_v8 }
0x1e4e   :  { %1387 = vrot.lane.b32.xlu1 %v1385_v9, %s1740_s13 }
0x1e56   :  { %1367 = vrot.lane.b32.xlu1 %v1365_v8, %s1740_s13 }
0x1e5a   :  { %v1375_v11 = vpop.permute.xlu0 %1374 }
0x1e5b   :  { %1378 = vst.msk [vmem:[#allocation8 - $0x4] sm:$0xc0] %vm444_vm13, %v1375_v11 }
0x1e5c   :  { %1446 = dma.vmem_to_hbm [thread:$0]  %s1439_s15, 64, %s1441_s0, [#allocation9], %s1740_s13, %s1740_s13, %s1745_s16  }
0x1e5e   :  { %929 = vrot.lane.b32.xlu1 %v2077_v57, %s1740_s13 }
0x1e62   :  { %v1004_v12 = vpop.permute.xlu0 %1003 }
0x1e63   :  { %1006 = vst.msk [vmem:[#allocation2] sm:$0x30] %vm369_vm12, %v1004_v12 }
0x1e66   :  { %1077 = vrot.lane.b32.xlu1 %v2119_v53, %s1740_s13 }
0x1e6a   :  { %v1220_v32 = vpop.permute.xlu0 %1219 }
0x1e6b   :  { %1222 = vst.msk [vmem:[#allocation2 + $0x8] sm:$0xc] %vm294_vm11, %v1220_v32 }
0x1e6e   :  { %1293 = vrot.lane.b32.xlu1 %v2150_v42, %s1740_s13 }
0x1ec0   :  { %v1388_v10 = vpop.permute.xlu1 %1387 }
0x1ec1   :  { %v1390_v13 = vsel %vm444_vm13, %v1388_v10, 0.0 }
0x1ec2   :  { %1391 = vadd.xlane.f32.xlu2 %v1390_v13 }
0x1ec8   :  { %v1368_v14 = vpop.permute.xlu1 %1367 }
0x1ec9   :  { %1370 = vst.msk [vmem:[#allocation2 + $0x8] sm:$0xc0] %vm444_vm13, %v1368_v14 }
0x1eca   :  { %1372 = vst.msk [vmem:[#allocation7 - $0x4] sm:$0xc0] %vm444_vm13, %v1368_v14 }
0x1ecb   :  { %1433 = dma.vmem_to_hbm [thread:$0]  %s1426_s5, 64, %s1428_s12, [#allocation6], %s1740_s13, %s1740_s13, %s1745_s16  }
0x1ed0   :  { %v930_v57 = vpop.permute.xlu1 %929 }
0x1ed1   :  { %932 = vst.msk [vmem:[#allocation2] sm:$0xc] %vm294_vm11, %v930_v57 }
0x1ed8   :  { %v1078_v53 = vpop.permute.xlu1 %1077 }
0x1ed9   :  { %1080 = vst.msk [vmem:[#allocation2] sm:$0xc0] %vm444_vm13, %v1078_v53 }
0x1ee0   :  { %v1294_v15 = vpop.permute.xlu1 %1293 }
0x1ee1   :  { %1296 = vst.msk [vmem:[#allocation2 + $0x8] sm:$0x30] %vm369_vm12, %v1294_v15 }
0x1f35   :  { %v1392_v18 = vpop.xlane.xlu2 %1391 }
0x1f36   :  { %v1397_v22 = vadd.f32 %v1524_v16, %v1392_v18 }
0x1f38   :  { %v1507_v21 = vmul.f32 -1.442695, %v1397_v22 }
0x1f3a   :  { %1653 = vpow2.f32 %v1507_v21 }
0x1f40   :  { %v1654_v19 = vpop.eup %1653 }
0x1f41   :  { %v1401_v23 = vadd.f32 1.0, %v1654_v19 }
0x1f43   :  { %1655 = vrcp.f32 %v1401_v23  ;;  %v1413_v28 = vand.u32 2147483648, %v1401_v23  ;;  %v1411_v31 = vand.u32 2147483647, %v1401_v23  ;;  %vm1407_vm13 = vweird.f32 %v1401_v23 }
0x1f45   :  { %v1414_v0 = vor.u32 1.1754944e-38, %v1413_v28  ;;  %vm1412_vm12 = vcmp.eq.f32.partialorder %v1411_v31, 8.507059e+37 }
0x1f49   :  { %v1656_v24 = vpop.eup %1655 }
0x1f4a   :  { %v1403_v25 = vmul.f32 %v1656_v24, %v1401_v23  ;;  %vm1408_vm11 = vweird.f32 %v1656_v24 }
0x1f4b   :  { %vm1409_vm7 = vmor %vm1407_vm13, %vm1408_vm11 }
0x1f4c   :  { %v1404_v26 = vsub.f32 1.0, %v1403_v25 }
0x1f4e   :  { %v1405_v29 = vmul.f32 %v1656_v24, %v1404_v26 }
0x1f50   :  { %v1406_v33 = vadd.f32 %v1656_v24, %v1405_v29 }
0x1f52   :  { %v1410_v34 = vsel %vm1409_vm7, %v1656_v24, %v1406_v33 }
0x1f53   :  { %v1415_v27 = vsel %vm1412_vm12, %v1414_v0, %v1410_v34 }
0x1f54   :  { %1418 = vst.msk [vmem:[%s2210_s9 - $0x6] sm:$0xc0] %vm1417_vm9, %v1415_v27 }
0x1f55   :  { %1731 = dma.done.wait [#allocation6], 64  }
0x1f56   :  { %1732 = vsyncadd [#allocation6], 4294967232 }
0x1f57   :  { %1733 = dma.done.wait [#allocation9], 64  }
0x1f58   :  { %1734 = vsyncadd [#allocation9], 4294967232 }
0x1f59   :  { %1457 = vsyncpa [#allocation5], 1 }
0x1f5a   :  { %1458 = vsyncpa [#allocation6], 1 }
0x1f5b   :  { %1459 = vsyncpa [#allocation9], 1 }

</bundles_post_ra>
